<compile_context>
chip_gen: v6e
topology: v6e:2x2x1
jax: 0.10.0
libtpu: 0.0.40
codegen_flags: <defaults>
</compile_context>

<pallas_src>
import jax
import jax.numpy as jnp
from jax.experimental import pallas as pl
from jax.experimental.pallas import tpu as pltpu

D_IN = 256      # fixed by the module (LayerNorm(256), reshape(-1, 256, 7, 7))
D_HID = 512     # hidden width of the FFN


def _round_up(n, m):
    return ((n + m - 1) // m) * m


def _device_defaults():
    """(max token tile, vmem limit) per TPU generation."""
    try:
        kind = jax.devices()[0].device_kind.lower()
    except Exception:
        kind = ""
    if "v5" in kind or "v6" in kind:
        return 2048, 64 * 1024 * 1024     # 128 MiB physical VMEM
    # v7x (64 MiB VMEM / TC) and unknown parts: be conservative.
    return 1024, 48 * 1024 * 1024


def _choose_tile(n_tokens, tm_max):
    """128-aligned token tile; prefer >= 2 balanced grid steps when possible."""
    tm = min(tm_max, _round_up(n_tokens, 128))
    if n_tokens > 128 and pl.cdiv(n_tokens, tm) < 2:
        # Split into two balanced blocks so the pipeline double-buffers and the
        # parallel axis can shard across v7x's two TensorCores.
        tm = _round_up(pl.cdiv(n_tokens, 2), 128)
    return max(tm, 128)


def ffn_kernel(x_ref, w1_ref, b1_ref, w2_ref, b2_ref, gamma_ref, beta_ref, o_ref):
    # x_ref: (TM, D_IN) token tile, bf16.  Feed bf16 straight to the MXU with f32
    # accumulation; keep an f32 copy for the residual / LayerNorm path.
    x_bf16 = x_ref[...]
    x_f32 = x_bf16.astype(jnp.float32)

    # w_2(relu(w_1(x)))  -- both matmuls on the MXU (bf16 in, f32 acc)
    h = jnp.dot(x_bf16, w1_ref[...], preferred_element_type=jnp.float32) + b1_ref[...]
    h = jnp.maximum(h, 0.0)
    y = jnp.dot(h.astype(jnp.bfloat16), w2_ref[...],
                preferred_element_type=jnp.float32) + b2_ref[...]

    # dropout = identity (inference), residual add in f32
    y = y + x_f32

    # LayerNorm over last dim (biased variance, eps inside sqrt), as in torch
    mean = jnp.mean(y, axis=-1, keepdims=True)
    centered = y - mean
    var = jnp.mean(centered * centered, axis=-1, keepdims=True)
    y_norm = centered * jax.lax.rsqrt(var + 1e-6)
    o_ref[...] = (y_norm * gamma_ref[...] + beta_ref[...]).astype(o_ref.dtype)


def positionwise_feed_forward(x, w1, b1, w2, b2, gamma, beta):
    """x: (B, 256, 7, 7) NCHW float32. Returns (B, 256, 7, 7) float32."""
    B, C, H, W = x.shape
    assert C == D_IN and H == 7 and W == 7
    N = B * H * W

    # flatten(-2) + permute(0,2,1) -> tokens-major (N, C), with the bf16 cast fused
    # into the same transpose so the standalone HBM round trip is half width and
    # the kernel reads bf16 directly.
    x_tok = jnp.transpose(x.reshape(B, C, H * W), (0, 2, 1)) \
              .astype(jnp.bfloat16).reshape(N, C)

    # Weights fetched once (constant index_map); bf16 halves their HBM bytes.
    w1_bf = w1.astype(jnp.bfloat16)
    w2_bf = w2.astype(jnp.bfloat16)

    tm_max, vmem_bytes = _device_defaults()
    tm = _choose_tile(N, tm_max)
    grid = (pl.cdiv(N, tm),)    # partial last block handled by Pallas masking

    cost = pl.CostEstimate(
        flops=2 * 2 * N * D_IN * D_HID,                        # two matmuls
        transcendentals=N,                                     # rsqrt per token
        bytes_accessed=(N * D_IN * 2                           # bf16 input
                        + N * D_IN * 4                         # f32 output
                        + 2 * D_IN * D_HID * 2                 # bf16 weights
                        + (2 * D_IN + D_HID) * 4),             # biases + LN params
    )

    out = pl.pallas_call(
        ffn_kernel,
        out_shape=jax.ShapeDtypeStruct((N, C), jnp.float32),
        grid_spec=pltpu.PrefetchScalarGridSpec(
            num_scalar_prefetch=0,
            grid=grid,
            in_specs=[
                pl.BlockSpec((tm, C), lambda i: (i, 0)),        # x tile (tokens, channels), bf16
                pl.BlockSpec((C, D_HID), lambda i: (0, 0)),     # w1 (d_in, d_hid), bf16, grid-invariant
                pl.BlockSpec((1, D_HID), lambda i: (0, 0)),     # b1 (f32)
                pl.BlockSpec((D_HID, C), lambda i: (0, 0)),     # w2 (d_hid, d_in), bf16, grid-invariant
                pl.BlockSpec((1, C), lambda i: (0, 0)),         # b2 (f32)
                pl.BlockSpec((1, C), lambda i: (0, 0)),         # layer_norm gamma (f32)
                pl.BlockSpec((1, C), lambda i: (0, 0)),         # layer_norm beta  (f32)
            ],
            out_specs=pl.BlockSpec((tm, C), lambda i: (i, 0)),  # lane-dense (last dim 256)
        ),
        compiler_params=pltpu.CompilerParams(
            # Parallel token axis: shards across both v7x TensorCores when grid >= 2.
            dimension_semantics=("parallel",),
            vmem_limit_bytes=vmem_bytes,
        ),
        cost_estimate=cost,
    )(x_tok, w1_bf, b1, w2_bf, b2, gamma, beta)

    y = out.reshape(B, H * W, C)               # (B, 49, 256)
    # permute(0,1,2) is an identity; then exact torch reshape semantics (raw reshape):
    return y.reshape(-1, D_IN, 7, 7)


def _reference(x, w1, b1, w2, b2, gamma, beta):
    B, C, H, W = x.shape
    t = jnp.transpose(x.reshape(B, C, H * W), (0, 2, 1))
    res = t
    h = jnp.maximum(t @ w1 + b1[0], 0.0)
    y = h @ w2 + b2[0]
    y = y + res
    mean = jnp.mean(y, axis=-1, keepdims=True)
    var = jnp.mean((y - mean) ** 2, axis=-1, keepdims=True)
    y = (y - mean) / jnp.sqrt(var + 1e-6) * gamma[0] + beta[0]
    return y.reshape(-1, D_IN, 7, 7)


if __name__ == "__main__":
    key = jax.random.PRNGKey(0)
    k_x, k_w1, k_b1, k_w2, k_b2 = jax.random.split(key, 5)

    B = 2
    x = jax.random.normal(k_x, (B, D_IN, 7, 7), dtype=jnp.float32)

    # Deterministic synthetic parameters (nn.Linear stores (out, in); we store transposed).
    w1 = jax.random.normal(k_w1, (D_IN, D_HID), dtype=jnp.float32) * (1.0 / jnp.sqrt(D_IN))
    b1 = jax.random.normal(k_b1, (1, D_HID), dtype=jnp.float32) * 0.02
    w2 = jax.random.normal(k_w2, (D_HID, D_IN), dtype=jnp.float32) * (1.0 / jnp.sqrt(D_HID))
    b2 = jax.random.normal(k_b2, (1, D_IN), dtype=jnp.float32) * 0.02
    gamma = jnp.ones((1, D_IN), dtype=jnp.float32)
    beta = jnp.zeros((1, D_IN), dtype=jnp.float32)

    out = positionwise_feed_forward(x, w1, b1, w2, b2, gamma, beta)
    out = jax.block_until_ready(out)

    ref = _reference(x, w1, b1, w2, b2, gamma, beta)
    assert out.shape == (B, D_IN, 7, 7)
    # bf16 input / bf16 matmul operands with f32 accumulation -> relaxed tolerance
    # vs. the f32 reference.
    assert jnp.allclose(out, ref, atol=5e-2, rtol=5e-2)

    print("KERNEL_OK")
</pallas_src>

<mosaic_0001>
module attributes {stable_mosaic.version = 11 : i64} {
  func.func @ffn_kernel(%arg0: i32, %arg1: memref<128x256xbf16, #tpu.memory_space<vmem>>, %arg2: memref<256x512xbf16, #tpu.memory_space<vmem>>, %arg3: memref<1x512xf32, #tpu.memory_space<vmem>>, %arg4: memref<512x256xbf16, #tpu.memory_space<vmem>>, %arg5: memref<1x256xf32, #tpu.memory_space<vmem>>, %arg6: memref<1x256xf32, #tpu.memory_space<vmem>>, %arg7: memref<1x256xf32, #tpu.memory_space<vmem>>, %arg8: memref<128x256xf32, #tpu.memory_space<vmem>>) attributes {dimension_semantics = [#tpu.dimension_semantics<parallel>], iteration_bounds = array<i64: 1>, scalar_prefetch = 0 : i64, scratch_operands = 0 : i64, tpu.core_type = #tpu.core_type<tc>, window_params = [{transform_indices = @transform_0, window_bounds = array<i64: 128, 256>}, {pipeline_mode = #tpu.pipeline_mode<synchronous>, transform_indices = @transform_1, window_bounds = array<i64: 256, 512>}, {pipeline_mode = #tpu.pipeline_mode<synchronous>, transform_indices = @transform_2, window_bounds = array<i64: 1, 512>}, {pipeline_mode = #tpu.pipeline_mode<synchronous>, transform_indices = @transform_3, window_bounds = array<i64: 512, 256>}, {pipeline_mode = #tpu.pipeline_mode<synchronous>, transform_indices = @transform_4, window_bounds = array<i64: 1, 256>}, {pipeline_mode = #tpu.pipeline_mode<synchronous>, transform_indices = @transform_5, window_bounds = array<i64: 1, 256>}, {pipeline_mode = #tpu.pipeline_mode<synchronous>, transform_indices = @transform_6, window_bounds = array<i64: 1, 256>}, {transform_indices = @transform_7, window_bounds = array<i64: 128, 256>}]} {
    %c0 = arith.constant 0 : index
    %c0_0 = arith.constant 0 : index
    %0 = vector.load %arg1[%c0, %c0_0] : memref<128x256xbf16, #tpu.memory_space<vmem>>, vector<128x256xbf16>
    %1 = arith.extf %0 : vector<128x256xbf16> to vector<128x256xf32>
    %c0_1 = arith.constant 0 : index
    %c0_2 = arith.constant 0 : index
    %2 = vector.load %arg2[%c0_1, %c0_2] : memref<256x512xbf16, #tpu.memory_space<vmem>>, vector<256x512xbf16>
    %cst = arith.constant dense<0.000000e+00> : vector<128x512xf32>
    %3 = tpu.matmul %0, %2, %cst {dimension_numbers = #tpu.dot_dimension_numbers<[1], [0], [0], [1], [0, 0, 1, 1], [], []>} : vector<128x256xbf16>, vector<256x512xbf16>, vector<128x512xf32> -> vector<128x512xf32>
    %c0_3 = arith.constant 0 : index
    %c0_4 = arith.constant 0 : index
    %4 = vector.load %arg3[%c0_3, %c0_4] : memref<1x512xf32, #tpu.memory_space<vmem>>, vector<1x512xf32>
    %5 = vector.broadcast %4 : vector<1x512xf32> to vector<128x512xf32>
    %6 = arith.addf %3, %5 : vector<128x512xf32>
    %cst_5 = arith.constant 0.000000e+00 : f32
    %7 = vector.broadcast %cst_5 : f32 to vector<128x512xf32>
    %8 = arith.maximumf %6, %7 : vector<128x512xf32>
    %9 = arith.truncf %8 : vector<128x512xf32> to vector<128x512xbf16>
    %c0_6 = arith.constant 0 : index
    %c0_7 = arith.constant 0 : index
    %10 = vector.load %arg4[%c0_6, %c0_7] : memref<512x256xbf16, #tpu.memory_space<vmem>>, vector<512x256xbf16>
    %cst_8 = arith.constant dense<0.000000e+00> : vector<128x256xf32>
    %11 = tpu.matmul %9, %10, %cst_8 {dimension_numbers = #tpu.dot_dimension_numbers<[1], [0], [0], [1], [0, 0, 1, 1], [], []>} : vector<128x512xbf16>, vector<512x256xbf16>, vector<128x256xf32> -> vector<128x256xf32>
    %c0_9 = arith.constant 0 : index
    %c0_10 = arith.constant 0 : index
    %12 = vector.load %arg5[%c0_9, %c0_10] : memref<1x256xf32, #tpu.memory_space<vmem>>, vector<1x256xf32>
    %13 = vector.broadcast %12 : vector<1x256xf32> to vector<128x256xf32>
    %14 = arith.addf %11, %13 : vector<128x256xf32>
    %15 = arith.addf %14, %1 : vector<128x256xf32>
    %cst_11 = arith.constant dense<0.000000e+00> : vector<128xf32>
    %16 = vector.multi_reduction <add>, %15, %cst_11 [1] : vector<128x256xf32> to vector<128xf32>
    %17 = vector.shape_cast %16 : vector<128xf32> to vector<128x1xf32>
    %cst_12 = arith.constant 2.560000e+02 : f32
    %18 = vector.broadcast %cst_12 : f32 to vector<128x1xf32>
    %19 = arith.divf %17, %18 : vector<128x1xf32>
    %20 = vector.broadcast %19 : vector<128x1xf32> to vector<128x256xf32>
    %21 = arith.subf %15, %20 : vector<128x256xf32>
    %22 = arith.mulf %21, %21 : vector<128x256xf32>
    %cst_13 = arith.constant dense<0.000000e+00> : vector<128xf32>
    %23 = vector.multi_reduction <add>, %22, %cst_13 [1] : vector<128x256xf32> to vector<128xf32>
    %24 = vector.shape_cast %23 : vector<128xf32> to vector<128x1xf32>
    %cst_14 = arith.constant 2.560000e+02 : f32
    %25 = vector.broadcast %cst_14 : f32 to vector<128x1xf32>
    %26 = arith.divf %24, %25 : vector<128x1xf32>
    %cst_15 = arith.constant 9.99999997E-7 : f32
    %27 = vector.broadcast %cst_15 : f32 to vector<128x1xf32>
    %28 = arith.addf %26, %27 : vector<128x1xf32>
    %29 = math.rsqrt %28 : vector<128x1xf32>
    %30 = vector.broadcast %29 : vector<128x1xf32> to vector<128x256xf32>
    %31 = arith.mulf %21, %30 : vector<128x256xf32>
    %c0_16 = arith.constant 0 : index
    %c0_17 = arith.constant 0 : index
    %32 = vector.load %arg6[%c0_16, %c0_17] : memref<1x256xf32, #tpu.memory_space<vmem>>, vector<1x256xf32>
    %33 = vector.broadcast %32 : vector<1x256xf32> to vector<128x256xf32>
    %34 = arith.mulf %31, %33 : vector<128x256xf32>
    %c0_18 = arith.constant 0 : index
    %c0_19 = arith.constant 0 : index
    %35 = vector.load %arg7[%c0_18, %c0_19] : memref<1x256xf32, #tpu.memory_space<vmem>>, vector<1x256xf32>
    %36 = vector.broadcast %35 : vector<1x256xf32> to vector<128x256xf32>
    %37 = arith.addf %34, %36 : vector<128x256xf32>
    %c0_20 = arith.constant 0 : index
    %c0_21 = arith.constant 0 : index
    %38 = vector.load %arg8[%c0_20, %c0_21] : memref<128x256xf32, #tpu.memory_space<vmem>>, vector<128x256xf32>
    tpu.vector_store %arg8[%c0_20, %c0_21], %37 {strides = array<i32>} : memref<128x256xf32, #tpu.memory_space<vmem>>, vector<128x256xf32>,
    return
  }
  func.func @transform_0(%arg0: i32) -> (i32, i32) {
    %c0_i32 = arith.constant 0 : i32
    %c0_i32_0 = arith.constant 0 : i32
    return %arg0, %c0_i32 : i32, i32
  }
  func.func @transform_1(%arg0: i32) -> (i32, i32) {
    %c0_i32 = arith.constant 0 : i32
    %c0_i32_0 = arith.constant 0 : i32
    %c0_i32_1 = arith.constant 0 : i32
    return %c0_i32, %c0_i32_0 : i32, i32
  }
  func.func @transform_2(%arg0: i32) -> (i32, i32) {
    %c0_i32 = arith.constant 0 : i32
    %c0_i32_0 = arith.constant 0 : i32
    %c0_i32_1 = arith.constant 0 : i32
    return %c0_i32, %c0_i32_0 : i32, i32
  }
  func.func @transform_3(%arg0: i32) -> (i32, i32) {
    %c0_i32 = arith.constant 0 : i32
    %c0_i32_0 = arith.constant 0 : i32
    %c0_i32_1 = arith.constant 0 : i32
    return %c0_i32, %c0_i32_0 : i32, i32
  }
  func.func @transform_4(%arg0: i32) -> (i32, i32) {
    %c0_i32 = arith.constant 0 : i32
    %c0_i32_0 = arith.constant 0 : i32
    %c0_i32_1 = arith.constant 0 : i32
    return %c0_i32, %c0_i32_0 : i32, i32
  }
  func.func @transform_5(%arg0: i32) -> (i32, i32) {
    %c0_i32 = arith.constant 0 : i32
    %c0_i32_0 = arith.constant 0 : i32
    %c0_i32_1 = arith.constant 0 : i32
    return %c0_i32, %c0_i32_0 : i32, i32
  }
  func.func @transform_6(%arg0: i32) -> (i32, i32) {
    %c0_i32 = arith.constant 0 : i32
    %c0_i32_0 = arith.constant 0 : i32
    %c0_i32_1 = arith.constant 0 : i32
    return %c0_i32, %c0_i32_0 : i32, i32
  }
  func.func @transform_7(%arg0: i32) -> (i32, i32) {
    %c0_i32 = arith.constant 0 : i32
    %c0_i32_0 = arith.constant 0 : i32
    return %arg0, %c0_i32 : i32, i32
  }
}

</mosaic_0001>

<bundles_post_ra>
// kernel: tpu_custom_call.1
= control target key start
LH: loop header
LB: loop body
LE: loop exit
PB: predicated region body
PF: predicated region fallthrough
CT: control target
= control target key end

     0   :  { %12 = vsyncpa [#allocation3], 0  ;;  %s3072_s0 = inlined_call_operand.hbm [shape: bf16[98,256], index: 0, kind: input, shape index: {}]   ;;  %s3073_s1 = inlined_call_operand.hbm [shape: bf16[256,512], index: 1, kind: input, shape index: {}]   ;;  %s3074_s2 = inlined_call_operand.hbm [shape: f32[1,512], index: 2, kind: input, shape index: {}]   ;;  %s3075_s3 = inlined_call_operand.hbm [shape: bf16[512,256], index: 3, kind: input, shape index: {}]   ;;  %s3076_s4 = inlined_call_operand.vmem [shape: f32[1,256], index: 4, kind: input, shape index: {}]   ;;  %s3077_s5 = inlined_call_operand.vmem [shape: f32[1,256], index: 5, kind: input, shape index: {}]   ;;  %s3078_s6 = inlined_call_operand.vmem [shape: f32[1,256], index: 6, kind: input, shape index: {}]   ;;  %s3079_s7 = inlined_call_operand.hbm [shape: f32[98,256], index: 7, kind: output, shape index: {}]  }
   0x1   :  { %13 = vsyncpa [#allocation6], 0 }
   0x2   :  { %14 = vsyncpa [#allocation9], 0 }
   0x3   :  { %15 = vsyncpa [#allocation4], 0 }
   0x4   :  { %20 = vsyncadd [#allocation3], 384  ;;  %s2502_s24 = smov [#allocation5]  }
   0x5   :  { %s33_s25 = sshll.u32 %s2502_s24, 4  ;;  %s34_s25 = int_to_ptr.vmem [resolvable:$true] %s33_s25 }
   0x6   :  { %s2402_s26 = scalar_lea.vmem %s34_s25, 8192  ;;  %p2407_p1 = scmp.lt.s32.totalorder %s34_s25, %s34_s25 }
   0x7   :  { %p2403_p0 = scmp.ne.s32.totalorder %s34_s25, %s2402_s26  ;;  %p2408_p2 = scmp.lt.s32.totalorder %s2402_s26, %s2402_s26 }
   0x9   :  { %p2409_p3 = por %p2408_p2, %p2407_p1 }
   0xb   :  { %p2410_p4 = pnand %p2409_p3, %p2403_p0 }
   0xd   :  { %2413 = shalt.err (!%p2410_p4)
}
   0xe   :  { %s2503_s27 = smov 256   ;;  %s2504_s28 = smov 16  }
   0xf   :  { %39 = dma.hbm_to_vmem [thread:$0]  %s3073_s1, 8192, %s34_s25, [#allocation6], %s2503_s27, %s2503_s27, %s2504_s28  }
  0x10   :  { %s2505_s8 = smov [#allocation2]  }
  0x11   :  { %s21_s9 = sshll.u32 %s2505_s8, 4  ;;  %s22_s9 = int_to_ptr.vmem [resolvable:$true] %s21_s9 }
  0x12   :  { %s2422_s10 = scalar_lea.vmem %s22_s9, 1664  ;;  %s2426_s11 = scalar_lea.vmem %s22_s9, 2048 }
  0x13   :  { %p2423_p5 = scmp.ne.s32.totalorder %s22_s9, %s2422_s10  ;;  %p2427_p6 = scmp.lt.s32.totalorder %s22_s9, %s22_s9 }
  0x14   :  { %p2428_p7 = scmp.lt.s32.totalorder %s2426_s11, %s2422_s10 }
  0x16   :  { %p2429_p8 = por %p2428_p7, %p2427_p6 }
  0x18   :  { %p2430_p9 = pnand %p2429_p8, %p2423_p5 }
  0x1a   :  { %2433 = shalt.err (!%p2430_p9)
}
  0x1b   :  { %s2506_s12 = smov 128   ;;  %s2507_s13 = smov 8  }
  0x1c   :  { %27 = dma.hbm_to_vmem [thread:$0]  %s3072_s0, 1664, %s22_s9, [#allocation3], %s2506_s12, %s2506_s12, %s2507_s13  }
  0x1d   :  { %s2508_s16 = smov [#allocation7]   ;;  %s2509_s1 = smov [#allocation8]  }
  0x1e   :  { %s46_s17 = sshll.u32 %s2508_s16, 4  ;;  %s55_s18 = sshll.u32 %s2509_s1, 4  ;;  %s47_s17 = int_to_ptr.vmem [resolvable:$true] %s46_s17  ;;  %s56_s18 = int_to_ptr.vmem [resolvable:$true] %s55_s18 }
  0x1f   :  { %s2442_s19 = scalar_lea.vmem %s47_s17, 64  ;;  %p2447_p11 = scmp.lt.s32.totalorder %s47_s17, %s47_s17 }
  0x20   :  { %p2443_p10 = scmp.ne.s32.totalorder %s47_s17, %s2442_s19  ;;  %p2448_p12 = scmp.lt.s32.totalorder %s2442_s19, %s2442_s19 }
  0x22   :  { %p2449_p13 = por %p2448_p12, %p2447_p11 }
  0x24   :  { %p2450_p0 = pnand %p2449_p13, %p2443_p10 }
  0x26   :  { %2453 = shalt.err (!%p2450_p0)
}
  0x27   :  { %49 = dma.hbm_to_vmem [thread:$0]  %s3074_s2, 64, %s47_s17, [#allocation6]  }
  0x28   :  { %s2462_s22 = scalar_lea.vmem %s56_s18, 8192  ;;  %p2467_p2 = scmp.lt.s32.totalorder %s56_s18, %s56_s18 }
  0x29   :  { %p2463_p1 = scmp.ne.s32.totalorder %s56_s18, %s2462_s22  ;;  %p2468_p3 = scmp.lt.s32.totalorder %s2462_s22, %s2462_s22 }
  0x2b   :  { %p2469_p4 = por %p2468_p3, %p2467_p2 }
  0x2d   :  { %p2470_p5 = pnand %p2469_p4, %p2463_p1 }
  0x2f   :  { %2473 = shalt.err (!%p2470_p5)
}
  0x30   :  { %61 = dma.hbm_to_vmem [thread:$0]  %s3075_s3, 8192, %s56_s18, [#allocation9], %s2506_s12, %s2506_s12, %s2507_s13  }
  0x31   :  { %2494 = dma.done.wait [#allocation3], 2048  }
  0x32   :  { %2495 = vsyncadd [#allocation3], 4294965248 }
  0x33   :  { %2496 = dma.done.wait [#allocation6], 8256  }
  0x34   :  { %2497 = vsyncadd [#allocation6], 4294959040 }
  0x35   :  { %2498 = dma.done.wait [#allocation9], 8192  }
  0x36   :  { %2499 = vsyncadd [#allocation9], 4294959104  ;;  %v2139_v0 = vld [vmem:[#allocation5 + $0xe4] ss:$16 sps:$4 sm:$0xff]   ;;  %v2141_v1 = vld [vmem:[#allocation5 + $0xec] ss:$16 sps:$4 sm:$0xff]  }
  0x37   :  { %614 = vmatprep.subr.bf16.mxu0 %v2139_v0  ;;  %v2143_v2 = vld [vmem:[#allocation5 + $0xe0] ss:$16 sps:$4 sm:$0xff]   ;;  %v2144_v3 = vld [vmem:[#allocation5 + $0xe8] ss:$16 sps:$4 sm:$0xff]   ;;  %727 = vmatprep.subr.bf16.mxu1 %v2141_v1  ;;  %v2145_v4 = vld [vmem:[#allocation5 + $0xc4] ss:$16 sps:$4 sm:$0xff]  }
  0x38   :  { %615 = vmatpush1.bf16.msra.mxu0 %v2143_v2  ;;  %728 = vmatpush1.bf16.msra.mxu1 %v2144_v3  ;;  %v2147_v5 = vld [vmem:[#allocation5 + $0xcc] ss:$16 sps:$4 sm:$0xff]   ;;  %v2149_v6 = vld [vmem:[#allocation5 + $0xc0] ss:$16 sps:$4 sm:$0xff]   ;;  %v2150_v7 = vld [vmem:[#allocation5 + $0xc8] ss:$16 sps:$4 sm:$0xff]  }
  0x39   :  { %616 = vmatprep.subr.bf16.mxu0 %v2145_v4  ;;  %729 = vmatprep.subr.bf16.mxu1 %v2147_v5  ;;  %v2151_v8 = vld [vmem:[#allocation5 + $0xa4] ss:$16 sps:$4 sm:$0xff]   ;;  %v2153_v9 = vld [vmem:[#allocation5 + $0xac] ss:$16 sps:$4 sm:$0xff]   ;;  %v2155_v10 = vld [vmem:[#allocation5 + $0xa0] ss:$16 sps:$4 sm:$0xff]  }
  0x3a   :  { %v2156_v11 = vld [vmem:[#allocation5 + $0xa8] ss:$16 sps:$4 sm:$0xff]   ;;  %v2157_v12 = vld [vmem:[#allocation5 + $0x84] ss:$16 sps:$4 sm:$0xff]   ;;  %v2159_v13 = vld [vmem:[#allocation5 + $0x8c] ss:$16 sps:$4 sm:$0xff]  }
  0x3b   :  { %v2161_v14 = vld [vmem:[#allocation5 + $0x80] ss:$16 sps:$4 sm:$0xff]   ;;  %v2162_v15 = vld [vmem:[#allocation5 + $0x88] ss:$16 sps:$4 sm:$0xff]   ;;  %v2163_v16 = vld [vmem:[#allocation5 + $0x64] ss:$16 sps:$4 sm:$0xff]  }
  0x3c   :  { %617 = vmatpush1.bf16.msra.mxu0 %v2149_v6  ;;  %730 = vmatpush1.bf16.msra.mxu1 %v2150_v7  ;;  %v2165_v17 = vld [vmem:[#allocation5 + $0x6c] ss:$16 sps:$4 sm:$0xff]   ;;  %v2167_v18 = vld [vmem:[#allocation5 + $0x60] ss:$16 sps:$4 sm:$0xff]   ;;  %v2168_v19 = vld [vmem:[#allocation5 + $0x68] ss:$16 sps:$4 sm:$0xff]  }
  0x3d   :  { %618 = vmatprep.subr.bf16.mxu0 %v2151_v8  ;;  %731 = vmatprep.subr.bf16.mxu1 %v2153_v9  ;;  %v2169_v20 = vld [vmem:[#allocation5 + $0x44] ss:$16 sps:$4 sm:$0xff]   ;;  %v2171_v21 = vld [vmem:[#allocation5 + $0x4c] ss:$16 sps:$4 sm:$0xff]   ;;  %v2173_v22 = vld [vmem:[#allocation5 + $0x40] ss:$16 sps:$4 sm:$0xff]  }
  0x3e   :  { %v2174_v23 = vld [vmem:[#allocation5 + $0x48] ss:$16 sps:$4 sm:$0xff]   ;;  %v2175_v24 = vld [vmem:[#allocation5 + $0x24] ss:$16 sps:$4 sm:$0xff]   ;;  %v2177_v25 = vld [vmem:[#allocation5 + $0x2c] ss:$16 sps:$4 sm:$0xff]  }
  0x3f   :  { %v2179_v26 = vld [vmem:[#allocation5 + $0x20] ss:$16 sps:$4 sm:$0xff]   ;;  %v2180_v27 = vld [vmem:[#allocation5 + $0x28] ss:$16 sps:$4 sm:$0xff]   ;;  %v2181_v28 = vld [vmem:[#allocation5 + $0x4] ss:$16 sps:$4 sm:$0xff]  }
  0x40   :  { %619 = vmatpush1.bf16.msra.mxu0 %v2155_v10  ;;  %732 = vmatpush1.bf16.msra.mxu1 %v2156_v11  ;;  %v2183_v29 = vld [vmem:[#allocation5 + $0xc] ss:$16 sps:$4 sm:$0xff]   ;;  %v2185_v30 = vld [vmem:[#allocation5] ss:$16 sps:$4 sm:$0xff]   ;;  %v2186_v31 = vld [vmem:[#allocation5 + $0x8] ss:$16 sps:$4 sm:$0xff]  }
  0x41   :  { %620 = vmatprep.subr.bf16.mxu0 %v2157_v12  ;;  %733 = vmatprep.subr.bf16.mxu1 %v2159_v13  ;;  %v2187_v32 = vld [vmem:[#allocation5 + $0x1e4] ss:$16 sps:$4 sm:$0xff]   ;;  %v2189_v33 = vld [vmem:[#allocation5 + $0x1ec] ss:$16 sps:$4 sm:$0xff]   ;;  %v2191_v34 = vld [vmem:[#allocation5 + $0x1e0] ss:$16 sps:$4 sm:$0xff]  }
  0x42   :  { %v2192_v35 = vld [vmem:[#allocation5 + $0x1e8] ss:$16 sps:$4 sm:$0xff]   ;;  %v2193_v36 = vld [vmem:[#allocation5 + $0x1c4] ss:$16 sps:$4 sm:$0xff]   ;;  %v2195_v37 = vld [vmem:[#allocation5 + $0x1cc] ss:$16 sps:$4 sm:$0xff]  }
  0x43   :  { %v2197_v38 = vld [vmem:[#allocation5 + $0x1c0] ss:$16 sps:$4 sm:$0xff]   ;;  %v2198_v39 = vld [vmem:[#allocation5 + $0x1c8] ss:$16 sps:$4 sm:$0xff]   ;;  %v2199_v40 = vld [vmem:[#allocation5 + $0x1a4] ss:$16 sps:$4 sm:$0xff]  }
  0x44   :  { %621 = vmatpush1.bf16.msra.mxu0 %v2161_v14  ;;  %734 = vmatpush1.bf16.msra.mxu1 %v2162_v15  ;;  %v2201_v41 = vld [vmem:[#allocation5 + $0x1ac] ss:$16 sps:$4 sm:$0xff]   ;;  %v2203_v42 = vld [vmem:[#allocation5 + $0x1a0] ss:$16 sps:$4 sm:$0xff]   ;;  %v2204_v43 = vld [vmem:[#allocation5 + $0x1a8] ss:$16 sps:$4 sm:$0xff]  }
  0x45   :  { %622 = vmatprep.subr.bf16.mxu0 %v2163_v16  ;;  %735 = vmatprep.subr.bf16.mxu1 %v2165_v17  ;;  %v2205_v44 = vld [vmem:[#allocation5 + $0x184] ss:$16 sps:$4 sm:$0xff]   ;;  %v2207_v45 = vld [vmem:[#allocation5 + $0x18c] ss:$16 sps:$4 sm:$0xff]   ;;  %v2209_v48 = vld [vmem:[#allocation5 + $0x180] ss:$16 sps:$4 sm:$0xff]  }
  0x46   :  { %v80_v46 = vld [vmem:[#allocation2] sm:$0xff]  ;;  %v81_v47 = vld [vmem:[#allocation2 + $0x8] sm:$0xff]  ;;  %v82_v3 = vld [vmem:[#allocation2 + $0x10] sm:$0xff] }
  0x47   :  { %v2210_v49 = vld [vmem:[#allocation5 + $0x188] ss:$16 sps:$4 sm:$0xff]   ;;  %v1987_v50 = vcombine.high %v80_v46, %v81_v47  ;;  %v2211_v51 = vld [vmem:[#allocation5 + $0x164] ss:$16 sps:$4 sm:$0xff]   ;;  %v2213_v52 = vld [vmem:[#allocation5 + $0x16c] ss:$16 sps:$4 sm:$0xff]   ;;  %v1986_v7 = vcombine.low %v80_v46, %v81_v47 }
  0x48   :  { %623 = vmatpush1.bf16.msra.mxu0 %v2167_v18  ;;  %736 = vmatpush1.bf16.msra.mxu1 %v2168_v19  ;;  %v2215_v53 = vld [vmem:[#allocation5 + $0x160] ss:$16 sps:$4 sm:$0xff]   ;;  %v2216_v54 = vld [vmem:[#allocation5 + $0x168] ss:$16 sps:$4 sm:$0xff]   ;;  %v2217_v55 = vld [vmem:[#allocation5 + $0x144] ss:$16 sps:$4 sm:$0xff]  }
  0x49   :  { %624 = vmatprep.subr.bf16.mxu0 %v2169_v20  ;;  %737 = vmatprep.subr.bf16.mxu1 %v2171_v21  ;;  %v2219_v56 = vld [vmem:[#allocation5 + $0x14c] ss:$16 sps:$4 sm:$0xff]   ;;  %v2221_v57 = vld [vmem:[#allocation5 + $0x140] ss:$16 sps:$4 sm:$0xff]   ;;  %v2222_v58 = vld [vmem:[#allocation5 + $0x148] ss:$16 sps:$4 sm:$0xff]  }
  0x4a   :  { %646 = vmatprep.mubr.bf16.mxu0 %v1987_v50  ;;  %759 = vmatprep.mubr.bf16.mxu1 %v1987_v50  ;;  %v2223_v59 = vld [vmem:[#allocation5 + $0x124] ss:$16 sps:$4 sm:$0xff]   ;;  %v2225_v60 = vld [vmem:[#allocation5 + $0x12c] ss:$16 sps:$4 sm:$0xff]   ;;  %v2227_v61 = vld [vmem:[#allocation5 + $0x120] ss:$16 sps:$4 sm:$0xff]  }
  0x4b   :  { %v2228_v62 = vld [vmem:[#allocation5 + $0x128] ss:$16 sps:$4 sm:$0xff]   ;;  %v2229_v63 = vld [vmem:[#allocation5 + $0x104] ss:$16 sps:$4 sm:$0xff]   ;;  %v2231_v0 = vld [vmem:[#allocation5 + $0x10c] ss:$16 sps:$4 sm:$0xff]  }
  0x4c   :  { %625 = vmatpush1.bf16.msra.mxu0 %v2173_v22  ;;  %738 = vmatpush1.bf16.msra.mxu1 %v2174_v23  ;;  %v2233_v1 = vld [vmem:[#allocation5 + $0x100] ss:$16 sps:$4 sm:$0xff]   ;;  %v2234_v2 = vld [vmem:[#allocation5 + $0x108] ss:$16 sps:$4 sm:$0xff]   ;;  %v2251_v9 = vld [vmem:[#allocation8 + $0x70] ss:$8 sps:$4 sm:$0xff]  }
  0x4d   :  { %626 = vmatprep.subr.bf16.mxu0 %v2175_v24  ;;  %739 = vmatprep.subr.bf16.mxu1 %v2177_v25  ;;  %v83_v4 = vld [vmem:[#allocation2 + $0x18] sm:$0xff]  ;;  %v2259_v11 = vld [vmem:[#allocation8 + $0x64] ss:$8 sps:$4 sm:$0xff]   ;;  %v84_v13 = vld [vmem:[#allocation2 + $0x20] sm:$0xff] }
  0x4e   :  { %v2253_v5 = vld [vmem:[#allocation8 + $0x74] ss:$8 sps:$4 sm:$0xff]   ;;  %v1989_v8 = vcombine.high %v82_v3, %v83_v4  ;;  %v2254_v10 = vld [vmem:[#allocation8 + $0x170] ss:$8 sps:$4 sm:$0xff]   ;;  %v2262_v12 = vld [vmem:[#allocation8 + $0x164] ss:$8 sps:$4 sm:$0xff]   ;;  %v1988_v19 = vcombine.low %v82_v3, %v83_v4 }
  0x4f   :  { %v2256_v6 = vld [vmem:[#allocation8 + $0x174] ss:$8 sps:$4 sm:$0xff]   ;;  %v85_v14 = vld [vmem:[#allocation2 + $0x28] sm:$0xff]  ;;  %v2263_v21 = vld [vmem:[#allocation8 + $0x50] ss:$8 sps:$4 sm:$0xff]  }
  0x50   :  { %627 = vmatpush1.bf16.msra.mxu0 %v2179_v26  ;;  %740 = vmatpush1.bf16.msra.mxu1 %v2180_v27  ;;  %v2257_v15 = vld [vmem:[#allocation8 + $0x60] ss:$8 sps:$4 sm:$0xff]   ;;  %v2265_v17 = vld [vmem:[#allocation8 + $0x54] ss:$8 sps:$4 sm:$0xff]   ;;  %v1991_v20 = vcombine.high %v84_v13, %v85_v14  ;;  %v2266_v22 = vld [vmem:[#allocation8 + $0x150] ss:$8 sps:$4 sm:$0xff]  }
  0x51   :  { %628 = vmatprep.subr.bf16.mxu0 %v2181_v28  ;;  %741 = vmatprep.subr.bf16.mxu1 %v2183_v29  ;;  %v2260_v16 = vld [vmem:[#allocation8 + $0x160] ss:$8 sps:$4 sm:$0xff]   ;;  %v2268_v18 = vld [vmem:[#allocation8 + $0x154] ss:$8 sps:$4 sm:$0xff]   ;;  %v2271_v23 = vld [vmem:[#allocation8 + $0x44] ss:$8 sps:$4 sm:$0xff]  }
  0x52   :  { %v2274_v24 = vld [vmem:[#allocation8 + $0x144] ss:$8 sps:$4 sm:$0xff]   ;;  %v87_v26 = vld [vmem:[#allocation2 + $0x38] sm:$0xff]  ;;  %v2269_v27 = vld [vmem:[#allocation8 + $0x40] ss:$8 sps:$4 sm:$0xff]  }
  0x53   :  { %v86_v25 = vld [vmem:[#allocation2 + $0x30] sm:$0xff]  ;;  %v2272_v28 = vld [vmem:[#allocation8 + $0x140] ss:$8 sps:$4 sm:$0xff]   ;;  %v2277_v29 = vld [vmem:[#allocation8 + $0x34] ss:$8 sps:$4 sm:$0xff]  }
  0x54   :  { %629 = vmatpush1.bf16.msra.mxu0 %v2185_v30  ;;  %742 = vmatpush1.bf16.msra.mxu1 %v2186_v31  ;;  %v2280_v30 = vld [vmem:[#allocation8 + $0x134] ss:$8 sps:$4 sm:$0xff]   ;;  %v1990_v31 = vcombine.low %v84_v13, %v85_v14  ;;  %v2290_v46 = vld [vmem:[#allocation8 + $0x110] ss:$8 sps:$4 sm:$0xff]   ;;  %v2295_v47 = vld [vmem:[#allocation8 + $0x4] ss:$8 sps:$4 sm:$0xff]  }
  0x55   :  { %630 = vmatprep.subr.bf16.mxu0 %v2187_v32  ;;  %743 = vmatprep.subr.bf16.mxu1 %v2189_v33  ;;  %v1993_v32 = vcombine.high %v86_v25, %v87_v26  ;;  %v2275_v33 = vld [vmem:[#allocation8 + $0x30] ss:$8 sps:$4 sm:$0xff]   ;;  %v2325_v13 = vld [vmem:[#allocation8 + $0xb4] ss:$8 sps:$4 sm:$0xff]  }
  0x56   :  { %v91_v50 = vld [vmem:[#allocation2 + $0x58] sm:$0xff] }
  0x57   :  { %v2328_v14 = vld [vmem:[#allocation8 + $0x1b4] ss:$8 sps:$4 sm:$0xff]  }
  0x58   :  { %631 = vmatpush2.bf16.msra.mxu0 %v2191_v34  ;;  %744 = vmatpush2.bf16.msra.mxu1 %v2192_v35  ;;  %v2278_v34 = vld [vmem:[#allocation8 + $0x130] ss:$8 sps:$4 sm:$0xff]   ;;  %v2283_v35 = vld [vmem:[#allocation8 + $0x24] ss:$8 sps:$4 sm:$0xff]  }
  0x59   :  { %632 = vmatprep.subr.bf16.mxu0 %v2193_v36  ;;  %745 = vmatprep.subr.bf16.mxu1 %v2195_v37  ;;  %v2286_v36 = vld [vmem:[#allocation8 + $0x124] ss:$8 sps:$4 sm:$0xff]   ;;  %v88_v37 = vld [vmem:[#allocation2 + $0x40] sm:$0xff] }
  0x5c   :  { %633 = vmatpush2.bf16.msra.mxu0 %v2197_v38  ;;  %746 = vmatpush2.bf16.msra.mxu1 %v2198_v39  ;;  %v89_v38 = vld [vmem:[#allocation2 + $0x48] sm:$0xff] }
  0x5d   :  { %634 = vmatprep.subr.bf16.mxu0 %v2199_v40  ;;  %747 = vmatprep.subr.bf16.mxu1 %v2201_v41  ;;  %v2281_v39 = vld [vmem:[#allocation8 + $0x20] ss:$8 sps:$4 sm:$0xff]   ;;  %v2289_v41 = vld [vmem:[#allocation8 + $0x14] ss:$8 sps:$4 sm:$0xff]  }
  0x5e   :  { %v2284_v40 = vld [vmem:[#allocation8 + $0x120] ss:$8 sps:$4 sm:$0xff]  }
  0x60   :  { %635 = vmatpush2.bf16.msra.mxu0 %v2203_v42  ;;  %748 = vmatpush2.bf16.msra.mxu1 %v2204_v43  ;;  %v2292_v42 = vld [vmem:[#allocation8 + $0x114] ss:$8 sps:$4 sm:$0xff]   ;;  %v1992_v43 = vcombine.low %v86_v25, %v87_v26  ;;  %v2335_v26 = vld [vmem:[#allocation8 + $0x90] ss:$8 sps:$4 sm:$0xff]  }
  0x61   :  { %636 = vmatprep.subr.bf16.mxu0 %v2205_v44  ;;  %749 = vmatprep.subr.bf16.mxu1 %v2207_v45  ;;  %v1995_v44 = vcombine.high %v88_v37, %v89_v38  ;;  %v2287_v45 = vld [vmem:[#allocation8 + $0x10] ss:$8 sps:$4 sm:$0xff]   ;;  %v2340_v25 = vld [vmem:[#allocation8 + $0x194] ss:$8 sps:$4 sm:$0xff]  }
  0x64   :  { %637 = vmatpush2.bf16.msra.mxu0 %v2209_v48  ;;  %750 = vmatpush2.bf16.msra.mxu1 %v2210_v49  ;;  %v2298_v48 = vld [vmem:[#allocation8 + $0x104] ss:$8 sps:$4 sm:$0xff]  }
  0x65   :  { %638 = vmatprep.subr.bf16.mxu0 %v2211_v51  ;;  %751 = vmatprep.subr.bf16.mxu1 %v2213_v52  ;;  %v2566_v49 = vld [vmem:[#allocation2 + $0x50] sm:$0xff]  ;;  %v2293_v51 = vld [vmem:[#allocation8] ss:$8 sps:$4 sm:$0xff]  }
  0x66   :  { %v2296_v52 = vld [vmem:[#allocation8 + $0x100] ss:$8 sps:$4 sm:$0xff]   ;;  %v1996_v3 = vcombine.low %v2566_v49, %v91_v50 }
  0x68   :  { %639 = vmatpush2.bf16.msra.mxu0 %v2215_v53  ;;  %752 = vmatpush2.bf16.msra.mxu1 %v2216_v54  ;;  %v2301_v53 = vld [vmem:[#allocation8 + $0xf4] ss:$8 sps:$4 sm:$0xff]  }
  0x69   :  { %640 = vmatprep.subr.bf16.mxu0 %v2217_v55  ;;  %753 = vmatprep.subr.bf16.mxu1 %v2219_v56  ;;  %v2304_v54 = vld [vmem:[#allocation8 + $0x1f4] ss:$8 sps:$4 sm:$0xff]   ;;  %v1994_v55 = vcombine.low %v88_v37, %v89_v38  ;;  %v1997_v56 = vcombine.high %v2566_v49, %v91_v50 }
  0x6a   :  { %v192_v38 = vld [vmem:[#allocation7] sm:$0xf] }
  0x6c   :  { %641 = vmatpush2.bf16.msra.mxu0 %v2221_v57  ;;  %754 = vmatpush2.bf16.msra.mxu1 %v2222_v58  ;;  %v2299_v57 = vld [vmem:[#allocation8 + $0xf0] ss:$8 sps:$4 sm:$0xff]  }
  0x6d   :  { %642 = vmatprep.subr.bf16.mxu0 %v2223_v59  ;;  %755 = vmatprep.subr.bf16.mxu1 %v2225_v60  ;;  %v2302_v58 = vld [vmem:[#allocation8 + $0x1f0] ss:$8 sps:$4 sm:$0xff]   ;;  %v2307_v59 = vld [vmem:[#allocation8 + $0xe4] ss:$8 sps:$4 sm:$0xff]  }
  0x6e   :  { %v2310_v60 = vld [vmem:[#allocation8 + $0x1e4] ss:$8 sps:$4 sm:$0xff]  }
  0x70   :  { %643 = vmatpush2.bf16.msra.mxu0 %v2227_v61  ;;  %756 = vmatpush2.bf16.msra.mxu1 %v2228_v62  ;;  %v2569_v61 = vld [vmem:[#allocation2 + $0x60] sm:$0xff]  ;;  %v93_v62 = vld [vmem:[#allocation2 + $0x68] sm:$0xff] }
  0x71   :  { %644 = vmatprep.subr.bf16.mxu0 %v2229_v63  ;;  %757 = vmatprep.subr.bf16.mxu1 %v2231_v0  ;;  %v2305_v63 = vld [vmem:[#allocation8 + $0xe0] ss:$8 sps:$4 sm:$0xff]   ;;  %v1999_v4 = vcombine.high %v2569_v61, %v93_v62 }
  0x72   :  { %v2308_v0 = vld [vmem:[#allocation8 + $0x1e0] ss:$8 sps:$4 sm:$0xff]  }
  0x74   :  { %645 = vmatpush2.bf16.msra.mxu0 %v2233_v1  ;;  %758 = vmatpush2.bf16.msra.mxu1 %v2234_v2  ;;  %v2313_v1 = vld [vmem:[#allocation8 + $0xd4] ss:$8 sps:$4 sm:$0xff]  }
  0x75   :  { %1332 = vmatprep.subr.bf16.mxu0 %v2253_v5  ;;  %1445 = vmatprep.subr.bf16.mxu1 %v2256_v6  ;;  %v2316_v2 = vld [vmem:[#allocation8 + $0x1d4] ss:$8 sps:$4 sm:$0xff]   ;;  %v2311_v5 = vld [vmem:[#allocation8 + $0xd0] ss:$8 sps:$4 sm:$0xff]  }
  0x76   :  { %v2314_v6 = vld [vmem:[#allocation8 + $0x1d0] ss:$8 sps:$4 sm:$0xff]  }
  0x77   :  { %647 = vmatmul.mubr.bf16.vlgmr.msra.gmra.mxu0 %v1986_v7  ;;  %760 = vmatmul.mubr.bf16.vlgmr.msra.gmra.mxu1 %v1986_v7  ;;  %v2319_v7 = vld [vmem:[#allocation8 + $0xc4] ss:$8 sps:$4 sm:$0xff]  }
  0x78   :  { %656 = vmatprep.mubr.bf16.mxu0 %v1989_v8  ;;  %769 = vmatprep.mubr.bf16.mxu1 %v1989_v8  ;;  %v2322_v8 = vld [vmem:[#allocation8 + $0x1c4] ss:$8 sps:$4 sm:$0xff]  }
  0x79   :  { %1333 = vmatpush1.bf16.msra.mxu0 %v2251_v9  ;;  %1446 = vmatpush1.bf16.msra.mxu1 %v2254_v10  ;;  %v94_v9 = vld [vmem:[#allocation2 + $0x70] sm:$0xff]  ;;  %v95_v10 = vld [vmem:[#allocation2 + $0x78] sm:$0xff] }
  0x7a   :  { %1334 = vmatprep.subr.bf16.mxu0 %v2259_v11  ;;  %1447 = vmatprep.subr.bf16.mxu1 %v2262_v12  ;;  %v2317_v11 = vld [vmem:[#allocation8 + $0xc0] ss:$8 sps:$4 sm:$0xff]  }
  0x7b   :  { %v2320_v12 = vld [vmem:[#allocation8 + $0x1c0] ss:$8 sps:$4 sm:$0xff]  }
  0x7d   :  { %1335 = vmatpush1.bf16.msra.mxu0 %v2257_v15  ;;  %1448 = vmatpush1.bf16.msra.mxu1 %v2260_v16  ;;  %v1998_v15 = vcombine.low %v2569_v61, %v93_v62  ;;  %v2001_v16 = vcombine.high %v94_v9, %v95_v10 }
  0x7e   :  { %1336 = vmatprep.subr.bf16.mxu0 %v2265_v17  ;;  %1449 = vmatprep.subr.bf16.mxu1 %v2268_v18  ;;  %v2323_v17 = vld [vmem:[#allocation8 + $0xb0] ss:$8 sps:$4 sm:$0xff]  }
  0x7f   :  { %657 = vmatmul.mubr.bf16.gmra.mxu0 %v1988_v19  ;;  %770 = vmatmul.mubr.bf16.gmra.mxu1 %v1988_v19  ;;  %v2326_v18 = vld [vmem:[#allocation8 + $0x1b0] ss:$8 sps:$4 sm:$0xff]   ;;  %v2000_v19 = vcombine.low %v94_v9, %v95_v10 }
  0x80   :  { %666 = vmatprep.mubr.bf16.mxu0 %v1991_v20  ;;  %779 = vmatprep.mubr.bf16.mxu1 %v1991_v20  ;;  %v2331_v20 = vld [vmem:[#allocation8 + $0xa4] ss:$8 sps:$4 sm:$0xff]  }
  0x81   :  { %1337 = vmatpush1.bf16.msra.mxu0 %v2263_v21  ;;  %1450 = vmatpush1.bf16.msra.mxu1 %v2266_v22  ;;  %v2334_v21 = vld [vmem:[#allocation8 + $0x1a4] ss:$8 sps:$4 sm:$0xff]   ;;  %v2329_v22 = vld [vmem:[#allocation8 + $0xa0] ss:$8 sps:$4 sm:$0xff]  }
  0x82   :  { %1338 = vmatprep.subr.bf16.mxu0 %v2271_v23  ;;  %1451 = vmatprep.subr.bf16.mxu1 %v2274_v24  ;;  %v2332_v23 = vld [vmem:[#allocation8 + $0x1a0] ss:$8 sps:$4 sm:$0xff]   ;;  %v2337_v24 = vld [vmem:[#allocation8 + $0x94] ss:$8 sps:$4 sm:$0xff]  }
  0x85   :  { %1339 = vmatpush1.bf16.msra.mxu0 %v2269_v27  ;;  %1452 = vmatpush1.bf16.msra.mxu1 %v2272_v28  ;;  %v2338_v27 = vld [vmem:[#allocation8 + $0x190] ss:$8 sps:$4 sm:$0xff]   ;;  %v2343_v28 = vld [vmem:[#allocation8 + $0x84] ss:$8 sps:$4 sm:$0xff]  }
  0x86   :  { %1340 = vmatprep.subr.bf16.mxu0 %v2277_v29  ;;  %1453 = vmatprep.subr.bf16.mxu1 %v2280_v30  ;;  %v2346_v29 = vld [vmem:[#allocation8 + $0x184] ss:$8 sps:$4 sm:$0xff]   ;;  %v2341_v30 = vld [vmem:[#allocation8 + $0x80] ss:$8 sps:$4 sm:$0xff]  }
  0x87   :  { %667 = vmatmul.mubr.bf16.gmra.mxu0 %v1990_v31  ;;  %780 = vmatmul.mubr.bf16.gmra.mxu1 %v1990_v31  ;;  %v2344_v31 = vld [vmem:[#allocation8 + $0x180] ss:$8 sps:$4 sm:$0xff]  }
  0x88   :  { %676 = vmatprep.mubr.bf16.mxu0 %v1993_v32  ;;  %789 = vmatprep.mubr.bf16.mxu1 %v1993_v32  ;;  %v194_v32 = vlaneseq }
  0x89   :  { %1341 = vmatpush1.bf16.msra.mxu0 %v2275_v33  ;;  %1454 = vmatpush1.bf16.msra.mxu1 %v2278_v34 }
  0x8a   :  { %1342 = vmatprep.subr.bf16.mxu0 %v2283_v35  ;;  %1455 = vmatprep.subr.bf16.mxu1 %v2286_v36  ;;  %v195_v33 = vshrl.u32 %v194_v32, 7 }
  0x8c   :  { %v2574_v34 = vsub.s32 1, %v195_v33  ;;  %v208_v35 = vsub.s32 3, %v195_v33  ;;  %v2576_v36 = vsub.s32 0, %v195_v33  ;;  %v204_v37 = vsub.s32 2, %v195_v33 }
  0x8d   :  { %1343 = vmatpush1.bf16.msra.mxu0 %v2281_v39  ;;  %1456 = vmatpush1.bf16.msra.mxu1 %v2284_v40 }
  0x8e   :  { %1344 = vmatprep.subr.bf16.mxu0 %v2289_v41  ;;  %1457 = vmatprep.subr.bf16.mxu1 %v2292_v42  ;;  %v2579_v41 = vrot.slane %v192_v38, %v2574_v34  ;;  %v2581_v42 = vrot.slane %v192_v38, %v208_v35 }
  0x8f   :  { %677 = vmatmul.mubr.bf16.gmra.mxu0 %v1992_v43  ;;  %790 = vmatmul.mubr.bf16.gmra.mxu1 %v1992_v43  ;;  %v2584_v43 = vrot.slane %v192_v38, %v2576_v36 }
  0x90   :  { %686 = vmatprep.mubr.bf16.mxu0 %v1995_v44  ;;  %799 = vmatprep.mubr.bf16.mxu1 %v1995_v44  ;;  %v2586_v44 = vrot.slane %v192_v38, %v204_v37 }
  0x91   :  { %1345 = vmatpush1.bf16.msra.mxu0 %v2287_v45  ;;  %1458 = vmatpush1.bf16.msra.mxu1 %v2290_v46 }
  0x92   :  { %1346 = vmatprep.subr.bf16.mxu0 %v2295_v47  ;;  %1459 = vmatprep.subr.bf16.mxu1 %v2298_v48 }
  0x95   :  { %1347 = vmatpush1.bf16.msra.mxu0 %v2293_v51  ;;  %1460 = vmatpush1.bf16.msra.mxu1 %v2296_v52 }
  0x96   :  { %1348 = vmatprep.subr.bf16.mxu0 %v2301_v53  ;;  %1461 = vmatprep.subr.bf16.mxu1 %v2304_v54 }
  0x97   :  { %687 = vmatmul.mubr.bf16.gmra.mxu0 %v1994_v55  ;;  %800 = vmatmul.mubr.bf16.gmra.mxu1 %v1994_v55 }
  0x98   :  { %696 = vmatprep.mubr.bf16.mxu0 %v1997_v56  ;;  %809 = vmatprep.mubr.bf16.mxu1 %v1997_v56 }
  0x99   :  { %1349 = vmatpush2.bf16.msra.mxu0 %v2299_v57  ;;  %1462 = vmatpush2.bf16.msra.mxu1 %v2302_v58 }
  0x9a   :  { %1350 = vmatprep.subr.bf16.mxu0 %v2307_v59  ;;  %1463 = vmatprep.subr.bf16.mxu1 %v2310_v60 }
  0x9d   :  { %1351 = vmatpush2.bf16.msra.mxu0 %v2305_v63  ;;  %1464 = vmatpush2.bf16.msra.mxu1 %v2308_v0 }
  0x9e   :  { %1352 = vmatprep.subr.bf16.mxu0 %v2313_v1  ;;  %1465 = vmatprep.subr.bf16.mxu1 %v2316_v2 }
  0x9f   :  { %697 = vmatmul.mubr.bf16.gmra.mxu0 %v1996_v3  ;;  %810 = vmatmul.mubr.bf16.gmra.mxu1 %v1996_v3 }
  0xa0   :  { %706 = vmatprep.mubr.bf16.mxu0 %v1999_v4  ;;  %819 = vmatprep.mubr.bf16.mxu1 %v1999_v4 }
  0xa1   :  { %1353 = vmatpush2.bf16.msra.mxu0 %v2311_v5  ;;  %1466 = vmatpush2.bf16.msra.mxu1 %v2314_v6 }
  0xa2   :  { %1354 = vmatprep.subr.bf16.mxu0 %v2319_v7  ;;  %1467 = vmatprep.subr.bf16.mxu1 %v2322_v8 }
  0xa5   :  { %1355 = vmatpush2.bf16.msra.mxu0 %v2317_v11  ;;  %1468 = vmatpush2.bf16.msra.mxu1 %v2320_v12 }
  0xa6   :  { %1356 = vmatprep.subr.bf16.mxu0 %v2325_v13  ;;  %1469 = vmatprep.subr.bf16.mxu1 %v2328_v14 }
  0xa7   :  { %707 = vmatmul.mubr.bf16.gmra.mxu0 %v1998_v15  ;;  %820 = vmatmul.mubr.bf16.gmra.mxu1 %v1998_v15 }
  0xa8   :  { %716 = vmatprep.mubr.bf16.mxu0 %v2001_v16  ;;  %829 = vmatprep.mubr.bf16.mxu1 %v2001_v16 }
  0xa9   :  { %1357 = vmatpush2.bf16.msra.mxu0 %v2323_v17  ;;  %1470 = vmatpush2.bf16.msra.mxu1 %v2326_v18 }
  0xaa   :  { %1358 = vmatprep.subr.bf16.mxu0 %v2331_v20  ;;  %1471 = vmatprep.subr.bf16.mxu1 %v2334_v21 }
  0xad   :  { %1359 = vmatpush2.bf16.msra.mxu0 %v2329_v22  ;;  %1472 = vmatpush2.bf16.msra.mxu1 %v2332_v23 }
  0xae   :  { %1360 = vmatprep.subr.bf16.mxu0 %v2337_v24  ;;  %1473 = vmatprep.subr.bf16.mxu1 %v2340_v25 }
  0xaf   :  { %717 = vmatmul.mubr.bf16.gmra.mxu0 %v2000_v19  ;;  %830 = vmatmul.mubr.bf16.gmra.mxu1 %v2000_v19 }
  0xb1   :  { %1361 = vmatpush2.bf16.msra.mxu0 %v2335_v26  ;;  %1474 = vmatpush2.bf16.msra.mxu1 %v2338_v27 }
  0xb2   :  { %1362 = vmatprep.subr.bf16.mxu0 %v2343_v28  ;;  %1475 = vmatprep.subr.bf16.mxu1 %v2346_v29 }
  0xb5   :  { %1363 = vmatpush2.bf16.msra.mxu0 %v2341_v30  ;;  %1476 = vmatpush2.bf16.msra.mxu1 %v2344_v31 }
 0x137   :  { %v648_v39 = vpop.f32.mrf.mxu0  ;;  %v761_v40 = vpop.f32.mrf.mxu1 }
 0x138   :  { %v649_v54 = vadd.f32 %v648_v39, %v2584_v43  ;;  %v762_v55 = vadd.f32 %v761_v40, %v2586_v44 }
 0x139   :  { %v650_v45 = vpop.f32.mrf.mxu0  ;;  %v763_v46 = vpop.f32.mrf.mxu1 }
 0x13a   :  { %v651_v50 = vadd.f32 %v650_v45, %v2579_v41  ;;  %v764_v51 = vadd.f32 %v763_v46, %v2581_v42  ;;  %v840_v5 = vmax.f32 %v649_v54, 0.0  ;;  %v842_v6 = vmax.f32 %v762_v55, 0.0 }
 0x13b   :  { %v652_v47 = vpop.f32.mrf.mxu0  ;;  %v765_v48 = vpop.f32.mrf.mxu1 }
 0x13c   :  { %v653_v52 = vadd.f32 %v652_v47, %v2584_v43  ;;  %v766_v53 = vadd.f32 %v765_v48, %v2586_v44  ;;  %v841_v1 = vmax.f32 %v651_v50, 0.0  ;;  %v843_v2 = vmax.f32 %v764_v51, 0.0 }
 0x13d   :  { %v654_v56 = vpop.f32.mrf.mxu0  ;;  %v767_v57 = vpop.f32.mrf.mxu1 }
 0x13e   :  { %v655_v58 = vadd.f32 %v654_v56, %v2579_v41  ;;  %v768_v59 = vadd.f32 %v767_v57, %v2581_v42  ;;  %v844_v60 = vmax.f32 %v653_v52, 0.0  ;;  %v846_v62 = vmax.f32 %v766_v53, 0.0 }
 0x13f   :  { %v658_v63 = vpop.f32.mrf.mxu0  ;;  %v771_v0 = vpop.f32.mrf.mxu1 }
 0x140   :  { %v845_v3 = vmax.f32 %v655_v58, 0.0  ;;  %v847_v4 = vmax.f32 %v768_v59, 0.0  ;;  %v904_v11 = vpack.c.bf16 %v844_v60, %v840_v5  ;;  %v906_v12 = vpack.c.bf16 %v846_v62, %v842_v6 }
 0x141   :  { %v660_v7 = vpop.f32.mrf.mxu0  ;;  %v773_v8 = vpop.f32.mrf.mxu1  ;;  %v659_v19 = vadd.f32 %v658_v63, %v2584_v43  ;;  %v772_v20 = vadd.f32 %v771_v0, %v2586_v44 }
 0x142   :  { %v905_v9 = vpack.c.bf16 %v845_v3, %v841_v1  ;;  %v907_v10 = vpack.c.bf16 %v847_v4, %v843_v2  ;;  %v661_v13 = vadd.f32 %v660_v7, %v2579_v41  ;;  %v774_v16 = vadd.f32 %v773_v8, %v2581_v42 }
 0x143   :  { %v662_v14 = vpop.f32.mrf.mxu0  ;;  %v775_v15 = vpop.f32.mrf.mxu1  ;;  %v848_v33 = vmax.f32 %v659_v19, 0.0  ;;  %v850_v35 = vmax.f32 %v772_v20, 0.0 }
 0x144   :  { %v663_v17 = vadd.f32 %v662_v14, %v2584_v43  ;;  %v776_v18 = vadd.f32 %v775_v15, %v2586_v44  ;;  %1364 = vmatprep.mubr.bf16.mxu0 %v905_v9  ;;  %1477 = vmatprep.mubr.bf16.mxu1 %v907_v10  ;;  %v849_v29 = vmax.f32 %v661_v13, 0.0  ;;  %v851_v30 = vmax.f32 %v774_v16, 0.0 }
 0x145   :  { %v664_v21 = vpop.f32.mrf.mxu0  ;;  %v777_v22 = vpop.f32.mrf.mxu1  ;;  %1365 = vmatmul.mubr.bf16.vlgmr.msra.gmra.mxu0 %v904_v11  ;;  %1478 = vmatmul.mubr.bf16.vlgmr.msra.gmra.mxu1 %v906_v12 }
 0x146   :  { %v665_v23 = vadd.f32 %v664_v21, %v2579_v41  ;;  %v778_v24 = vadd.f32 %v777_v22, %v2581_v42  ;;  %v852_v25 = vmax.f32 %v663_v17, 0.0  ;;  %v854_v26 = vmax.f32 %v776_v18, 0.0 }
 0x147   :  { %v668_v27 = vpop.f32.mrf.mxu0  ;;  %v781_v28 = vpop.f32.mrf.mxu1 }
 0x148   :  { %v853_v31 = vmax.f32 %v665_v23, 0.0  ;;  %v855_v32 = vmax.f32 %v778_v24, 0.0  ;;  %v908_v45 = vpack.c.bf16 %v852_v25, %v848_v33  ;;  %v910_v46 = vpack.c.bf16 %v854_v26, %v850_v35 }
 0x149   :  { %v670_v37 = vpop.f32.mrf.mxu0  ;;  %v783_v38 = vpop.f32.mrf.mxu1  ;;  %v669_v54 = vadd.f32 %v668_v27, %v2584_v43  ;;  %v782_v55 = vadd.f32 %v781_v28, %v2586_v44 }
 0x14a   :  { %v909_v39 = vpack.c.bf16 %v853_v31, %v849_v29  ;;  %v911_v40 = vpack.c.bf16 %v855_v32, %v851_v30  ;;  %v671_v47 = vadd.f32 %v670_v37, %v2579_v41  ;;  %v784_v51 = vadd.f32 %v783_v38, %v2581_v42 }
 0x14b   :  { %v672_v48 = vpop.f32.mrf.mxu0  ;;  %v785_v50 = vpop.f32.mrf.mxu1  ;;  %v856_v5 = vmax.f32 %v669_v54, 0.0  ;;  %v858_v6 = vmax.f32 %v782_v55, 0.0 }
 0x14c   :  { %v673_v52 = vadd.f32 %v672_v48, %v2584_v43  ;;  %v786_v53 = vadd.f32 %v785_v50, %v2586_v44  ;;  %1374 = vmatprep.mubr.bf16.mxu0 %v909_v39  ;;  %1487 = vmatprep.mubr.bf16.mxu1 %v911_v40  ;;  %v857_v1 = vmax.f32 %v671_v47, 0.0  ;;  %v859_v2 = vmax.f32 %v784_v51, 0.0 }
 0x14d   :  { %v674_v56 = vpop.f32.mrf.mxu0  ;;  %v787_v57 = vpop.f32.mrf.mxu1  ;;  %1375 = vmatmul.mubr.bf16.gmra.mxu0 %v908_v45  ;;  %1488 = vmatmul.mubr.bf16.gmra.mxu1 %v910_v46 }
 0x14e   :  { %v675_v58 = vadd.f32 %v674_v56, %v2579_v41  ;;  %v788_v59 = vadd.f32 %v787_v57, %v2581_v42  ;;  %v860_v60 = vmax.f32 %v673_v52, 0.0  ;;  %v862_v62 = vmax.f32 %v786_v53, 0.0 }
 0x14f   :  { %v678_v63 = vpop.f32.mrf.mxu0  ;;  %v791_v0 = vpop.f32.mrf.mxu1 }
 0x150   :  { %v861_v3 = vmax.f32 %v675_v58, 0.0  ;;  %v863_v4 = vmax.f32 %v788_v59, 0.0  ;;  %v912_v11 = vpack.c.bf16 %v860_v60, %v856_v5  ;;  %v914_v12 = vpack.c.bf16 %v862_v62, %v858_v6 }
 0x151   :  { %v680_v7 = vpop.f32.mrf.mxu0  ;;  %v793_v8 = vpop.f32.mrf.mxu1  ;;  %v679_v19 = vadd.f32 %v678_v63, %v2584_v43  ;;  %v792_v20 = vadd.f32 %v791_v0, %v2586_v44 }
 0x152   :  { %v913_v9 = vpack.c.bf16 %v861_v3, %v857_v1  ;;  %v915_v10 = vpack.c.bf16 %v863_v4, %v859_v2  ;;  %v681_v13 = vadd.f32 %v680_v7, %v2579_v41  ;;  %v794_v16 = vadd.f32 %v793_v8, %v2581_v42 }
 0x153   :  { %v682_v14 = vpop.f32.mrf.mxu0  ;;  %v795_v15 = vpop.f32.mrf.mxu1  ;;  %v864_v33 = vmax.f32 %v679_v19, 0.0  ;;  %v866_v35 = vmax.f32 %v792_v20, 0.0 }
 0x154   :  { %v683_v17 = vadd.f32 %v682_v14, %v2584_v43  ;;  %v796_v18 = vadd.f32 %v795_v15, %v2586_v44  ;;  %1384 = vmatprep.mubr.bf16.mxu0 %v913_v9  ;;  %1497 = vmatprep.mubr.bf16.mxu1 %v915_v10  ;;  %v865_v29 = vmax.f32 %v681_v13, 0.0  ;;  %v867_v30 = vmax.f32 %v794_v16, 0.0 }
 0x155   :  { %v684_v21 = vpop.f32.mrf.mxu0  ;;  %v797_v22 = vpop.f32.mrf.mxu1  ;;  %1385 = vmatmul.mubr.bf16.gmra.mxu0 %v912_v11  ;;  %1498 = vmatmul.mubr.bf16.gmra.mxu1 %v914_v12 }
 0x156   :  { %v685_v23 = vadd.f32 %v684_v21, %v2579_v41  ;;  %v798_v24 = vadd.f32 %v797_v22, %v2581_v42  ;;  %v868_v25 = vmax.f32 %v683_v17, 0.0  ;;  %v870_v26 = vmax.f32 %v796_v18, 0.0 }
 0x157   :  { %v688_v27 = vpop.f32.mrf.mxu0  ;;  %v801_v28 = vpop.f32.mrf.mxu1 }
 0x158   :  { %v869_v31 = vmax.f32 %v685_v23, 0.0  ;;  %v871_v32 = vmax.f32 %v798_v24, 0.0  ;;  %v916_v45 = vpack.c.bf16 %v868_v25, %v864_v33  ;;  %v918_v46 = vpack.c.bf16 %v870_v26, %v866_v35 }
 0x159   :  { %v690_v37 = vpop.f32.mrf.mxu0  ;;  %v803_v38 = vpop.f32.mrf.mxu1  ;;  %v689_v54 = vadd.f32 %v688_v27, %v2584_v43  ;;  %v802_v55 = vadd.f32 %v801_v28, %v2586_v44 }
 0x15a   :  { %v917_v39 = vpack.c.bf16 %v869_v31, %v865_v29  ;;  %v919_v40 = vpack.c.bf16 %v871_v32, %v867_v30  ;;  %v691_v47 = vadd.f32 %v690_v37, %v2579_v41  ;;  %v804_v51 = vadd.f32 %v803_v38, %v2581_v42 }
 0x15b   :  { %v692_v48 = vpop.f32.mrf.mxu0  ;;  %v805_v50 = vpop.f32.mrf.mxu1  ;;  %v872_v5 = vmax.f32 %v689_v54, 0.0  ;;  %v874_v6 = vmax.f32 %v802_v55, 0.0 }
 0x15c   :  { %v693_v52 = vadd.f32 %v692_v48, %v2584_v43  ;;  %v806_v53 = vadd.f32 %v805_v50, %v2586_v44  ;;  %1394 = vmatprep.mubr.bf16.mxu0 %v917_v39  ;;  %1507 = vmatprep.mubr.bf16.mxu1 %v919_v40  ;;  %v873_v1 = vmax.f32 %v691_v47, 0.0  ;;  %v875_v2 = vmax.f32 %v804_v51, 0.0 }
 0x15d   :  { %v694_v56 = vpop.f32.mrf.mxu0  ;;  %v807_v57 = vpop.f32.mrf.mxu1  ;;  %1395 = vmatmul.mubr.bf16.gmra.mxu0 %v916_v45  ;;  %1508 = vmatmul.mubr.bf16.gmra.mxu1 %v918_v46 }
 0x15e   :  { %v695_v58 = vadd.f32 %v694_v56, %v2579_v41  ;;  %v808_v59 = vadd.f32 %v807_v57, %v2581_v42  ;;  %v876_v60 = vmax.f32 %v693_v52, 0.0  ;;  %v878_v62 = vmax.f32 %v806_v53, 0.0 }
 0x15f   :  { %v698_v63 = vpop.f32.mrf.mxu0  ;;  %v811_v0 = vpop.f32.mrf.mxu1 }
 0x160   :  { %v877_v3 = vmax.f32 %v695_v58, 0.0  ;;  %v879_v4 = vmax.f32 %v808_v59, 0.0  ;;  %v920_v11 = vpack.c.bf16 %v876_v60, %v872_v5  ;;  %v922_v12 = vpack.c.bf16 %v878_v62, %v874_v6 }
 0x161   :  { %v700_v7 = vpop.f32.mrf.mxu0  ;;  %v813_v8 = vpop.f32.mrf.mxu1  ;;  %v699_v19 = vadd.f32 %v698_v63, %v2584_v43  ;;  %v812_v20 = vadd.f32 %v811_v0, %v2586_v44 }
 0x162   :  { %v921_v9 = vpack.c.bf16 %v877_v3, %v873_v1  ;;  %v923_v10 = vpack.c.bf16 %v879_v4, %v875_v2  ;;  %v701_v13 = vadd.f32 %v700_v7, %v2579_v41  ;;  %v814_v16 = vadd.f32 %v813_v8, %v2581_v42 }
 0x163   :  { %v702_v14 = vpop.f32.mrf.mxu0  ;;  %v815_v15 = vpop.f32.mrf.mxu1  ;;  %v880_v33 = vmax.f32 %v699_v19, 0.0  ;;  %v882_v35 = vmax.f32 %v812_v20, 0.0 }
 0x164   :  { %v703_v17 = vadd.f32 %v702_v14, %v2584_v43  ;;  %v816_v18 = vadd.f32 %v815_v15, %v2586_v44  ;;  %1404 = vmatprep.mubr.bf16.mxu0 %v921_v9  ;;  %1517 = vmatprep.mubr.bf16.mxu1 %v923_v10  ;;  %v881_v29 = vmax.f32 %v701_v13, 0.0  ;;  %v883_v30 = vmax.f32 %v814_v16, 0.0 }
 0x165   :  { %v704_v21 = vpop.f32.mrf.mxu0  ;;  %v817_v22 = vpop.f32.mrf.mxu1  ;;  %1405 = vmatmul.mubr.bf16.gmra.mxu0 %v920_v11  ;;  %1518 = vmatmul.mubr.bf16.gmra.mxu1 %v922_v12 }
 0x166   :  { %v705_v23 = vadd.f32 %v704_v21, %v2579_v41  ;;  %v818_v24 = vadd.f32 %v817_v22, %v2581_v42  ;;  %v884_v25 = vmax.f32 %v703_v17, 0.0  ;;  %v886_v26 = vmax.f32 %v816_v18, 0.0 }
 0x167   :  { %v708_v27 = vpop.f32.mrf.mxu0  ;;  %v821_v28 = vpop.f32.mrf.mxu1 }
 0x168   :  { %v885_v31 = vmax.f32 %v705_v23, 0.0  ;;  %v887_v32 = vmax.f32 %v818_v24, 0.0  ;;  %v924_v45 = vpack.c.bf16 %v884_v25, %v880_v33  ;;  %v926_v46 = vpack.c.bf16 %v886_v26, %v882_v35 }
 0x169   :  { %v710_v37 = vpop.f32.mrf.mxu0  ;;  %v823_v38 = vpop.f32.mrf.mxu1  ;;  %v709_v54 = vadd.f32 %v708_v27, %v2584_v43  ;;  %v822_v55 = vadd.f32 %v821_v28, %v2586_v44 }
 0x16a   :  { %v925_v39 = vpack.c.bf16 %v885_v31, %v881_v29  ;;  %v927_v40 = vpack.c.bf16 %v887_v32, %v883_v30  ;;  %v711_v47 = vadd.f32 %v710_v37, %v2579_v41  ;;  %v824_v51 = vadd.f32 %v823_v38, %v2581_v42 }
 0x16b   :  { %v712_v48 = vpop.f32.mrf.mxu0  ;;  %v825_v50 = vpop.f32.mrf.mxu1  ;;  %v888_v5 = vmax.f32 %v709_v54, 0.0  ;;  %v890_v6 = vmax.f32 %v822_v55, 0.0 }
 0x16c   :  { %v713_v52 = vadd.f32 %v712_v48, %v2584_v43  ;;  %v826_v53 = vadd.f32 %v825_v50, %v2586_v44  ;;  %1414 = vmatprep.mubr.bf16.mxu0 %v925_v39  ;;  %1527 = vmatprep.mubr.bf16.mxu1 %v927_v40  ;;  %v889_v1 = vmax.f32 %v711_v47, 0.0  ;;  %v891_v2 = vmax.f32 %v824_v51, 0.0  ;;  %v2379_v50 = vld [vmem:[#allocation2] sm:$0xff] }
 0x16d   :  { %v714_v56 = vpop.f32.mrf.mxu0  ;;  %v827_v57 = vpop.f32.mrf.mxu1  ;;  %1415 = vmatmul.mubr.bf16.gmra.mxu0 %v924_v45  ;;  %1528 = vmatmul.mubr.bf16.gmra.mxu1 %v926_v46  ;;  %v96_v51 = vunpack.c.l.bf16 %v2379_v50 }
 0x16e   :  { %v715_v58 = vadd.f32 %v714_v56, %v2579_v41  ;;  %v828_v59 = vadd.f32 %v827_v57, %v2581_v42  ;;  %v892_v60 = vmax.f32 %v713_v52, 0.0  ;;  %v894_v62 = vmax.f32 %v826_v53, 0.0  ;;  %v2380_v57 = vld [vmem:[#allocation2 + $0x8] sm:$0xff] }
 0x16f   :  { %v718_v63 = vpop.f32.mrf.mxu0  ;;  %v831_v0 = vpop.f32.mrf.mxu1  ;;  %v97_v52 = vunpack.c.h.bf16 %v2379_v50 }
 0x170   :  { %v893_v3 = vmax.f32 %v715_v58, 0.0  ;;  %v895_v4 = vmax.f32 %v828_v59, 0.0  ;;  %v928_v11 = vpack.c.bf16 %v892_v60, %v888_v5  ;;  %v930_v12 = vpack.c.bf16 %v894_v62, %v890_v6 }
 0x171   :  { %v720_v7 = vpop.f32.mrf.mxu0  ;;  %v833_v8 = vpop.f32.mrf.mxu1  ;;  %v719_v19 = vadd.f32 %v718_v63, %v2584_v43  ;;  %v832_v20 = vadd.f32 %v831_v0, %v2586_v44  ;;  %v98_v58 = vunpack.c.l.bf16 %v2380_v57  ;;  %v99_v60 = vunpack.c.h.bf16 %v2380_v57 }
 0x172   :  { %v929_v9 = vpack.c.bf16 %v893_v3, %v889_v1  ;;  %v931_v10 = vpack.c.bf16 %v895_v4, %v891_v2  ;;  %v721_v13 = vadd.f32 %v720_v7, %v2579_v41  ;;  %v834_v16 = vadd.f32 %v833_v8, %v2581_v42 }
 0x173   :  { %v722_v14 = vpop.f32.mrf.mxu0  ;;  %v835_v15 = vpop.f32.mrf.mxu1  ;;  %v896_v31 = vmax.f32 %v719_v19, 0.0  ;;  %v898_v32 = vmax.f32 %v832_v20, 0.0 }
 0x174   :  { %v723_v17 = vadd.f32 %v722_v14, %v2584_v43  ;;  %v836_v18 = vadd.f32 %v835_v15, %v2586_v44  ;;  %1424 = vmatprep.mubr.bf16.mxu0 %v929_v9  ;;  %1537 = vmatprep.mubr.bf16.mxu1 %v931_v10  ;;  %v897_v27 = vmax.f32 %v721_v13, 0.0  ;;  %v899_v28 = vmax.f32 %v834_v16, 0.0  ;;  %v2381_v10 = vld [vmem:[#allocation2 + $0x10] sm:$0xff] }
 0x175   :  { %v724_v21 = vpop.f32.mrf.mxu0  ;;  %v837_v22 = vpop.f32.mrf.mxu1  ;;  %1425 = vmatmul.mubr.bf16.gmra.mxu0 %v928_v11  ;;  %1538 = vmatmul.mubr.bf16.gmra.mxu1 %v930_v12  ;;  %v100_v11 = vunpack.c.l.bf16 %v2381_v10  ;;  %v101_v12 = vunpack.c.h.bf16 %v2381_v10 }
 0x176   :  { %v725_v23 = vadd.f32 %v724_v21, %v2579_v41  ;;  %v838_v24 = vadd.f32 %v837_v22, %v2581_v42  ;;  %v900_v25 = vmax.f32 %v723_v17, 0.0  ;;  %v902_v26 = vmax.f32 %v836_v18, 0.0  ;;  %v1000_v41 = vld [vmem:[%s3076_s4] sm:$0x3]  ;;  %v2382_v22 = vld [vmem:[#allocation2 + $0x18] sm:$0xff] }
 0x177   :  { %v2656_v42 = vrot.slane %v1000_v41, %v2576_v36  ;;  %v2659_v37 = vrot.slane %v1000_v41, %v2574_v34 }
 0x178   :  { %v901_v29 = vmax.f32 %v725_v23, 0.0  ;;  %v903_v30 = vmax.f32 %v838_v24, 0.0  ;;  %v932_v35 = vpack.c.bf16 %v900_v25, %v896_v31  ;;  %v934_v44 = vpack.c.bf16 %v902_v26, %v898_v32 }
 0x179   :  { %v102_v23 = vunpack.c.l.bf16 %v2382_v22  ;;  %v103_v25 = vunpack.c.h.bf16 %v2382_v22 }
 0x17a   :  { %v933_v33 = vpack.c.bf16 %v901_v29, %v897_v27  ;;  %v935_v43 = vpack.c.bf16 %v903_v30, %v899_v28 }
 0x17c   :  { %1434 = vmatprep.mubr.bf16.mxu0 %v933_v33  ;;  %1547 = vmatprep.mubr.bf16.mxu1 %v935_v43 }
 0x17d   :  { %1435 = vmatmul.mubr.bf16.gmra.mxu0 %v932_v35  ;;  %1548 = vmatmul.mubr.bf16.gmra.mxu1 %v934_v44  ;;  %v2383_v44 = vld [vmem:[#allocation2 + $0x20] sm:$0xff] }
 0x17e   :  { %v104_v41 = vunpack.c.l.bf16 %v2383_v44 }
 0x205   :  { %v1366_v38 = vpop.f32.mrf.mxu0  ;;  %v1479_v39 = vpop.f32.mrf.mxu1 }
 0x206   :  { %v1367_v40 = vadd.f32 %v1366_v38, %v2656_v42 }
 0x207   :  { %v1368_v45 = vpop.f32.mrf.mxu0  ;;  %v1481_v46 = vpop.f32.mrf.mxu1 }
 0x208   :  { %v1480_v47 = vadd.f32 %v1479_v39, %v1367_v40  ;;  %v1369_v48 = vadd.f32 %v1368_v45, %v2659_v37  ;;  %v105_v39 = vunpack.c.h.bf16 %v2383_v44 }
 0x209   :  { %v1370_v53 = vpop.f32.mrf.mxu0  ;;  %v1483_v54 = vpop.f32.mrf.mxu1 }
 0x20a   :  { %v1482_v55 = vadd.f32 %v1481_v46, %v1369_v48  ;;  %v1371_v56 = vadd.f32 %v1370_v53, %v2656_v42  ;;  %v2665_v1 = vadd.f32 %v1480_v47, %v96_v51 }
 0x20b   :  { %v1372_v59 = vpop.f32.mrf.mxu0  ;;  %v1485_v62 = vpop.f32.mrf.mxu1 }
 0x20c   :  { %v1484_v63 = vadd.f32 %v1483_v54, %v1371_v56  ;;  %v1373_v0 = vadd.f32 %v1372_v59, %v2659_v37  ;;  %v2667_v2 = vadd.f32 %v1482_v55, %v97_v52  ;;  %v2384_v55 = vld [vmem:[#allocation2 + $0x28] sm:$0xff] }
 0x20d   :  { %v1376_v3 = vpop.f32.mrf.mxu0  ;;  %v1489_v4 = vpop.f32.mrf.mxu1  ;;  %v106_v56 = vunpack.c.l.bf16 %v2384_v55 }
 0x20e   :  { %v1486_v5 = vadd.f32 %v1485_v62, %v1373_v0  ;;  %v1377_v6 = vadd.f32 %v1376_v3, %v2656_v42  ;;  %v1590_v7 = vadd.f32 %v2667_v2, %v2665_v1  ;;  %v2672_v13 = vadd.f32 %v1484_v63, %v98_v58 }
 0x20f   :  { %v1378_v8 = vpop.f32.mrf.mxu0  ;;  %v1491_v9 = vpop.f32.mrf.mxu1  ;;  %v107_v58 = vunpack.c.h.bf16 %v2384_v55 }
 0x210   :  { %v2674_v14 = vadd.f32 %v1486_v5, %v99_v60  ;;  %v1490_v15 = vadd.f32 %v1489_v4, %v1377_v6  ;;  %v1379_v16 = vadd.f32 %v1378_v8, %v2659_v37  ;;  %1591 = vadd.xlane.f32.xlu0 %v1590_v7  ;;  %v2385_v8 = vld [vmem:[#allocation2 + $0x30] sm:$0xff] }
 0x211   :  { %v1380_v17 = vpop.f32.mrf.mxu0  ;;  %v1493_v18 = vpop.f32.mrf.mxu1 }
 0x212   :  { %v1492_v19 = vadd.f32 %v1491_v9, %v1379_v16  ;;  %v1381_v20 = vadd.f32 %v1380_v17, %v2656_v42  ;;  %v1593_v21 = vadd.f32 %v2674_v14, %v2672_v13  ;;  %v2681_v29 = vadd.f32 %v1490_v15, %v100_v11 }
 0x213   :  { %v1382_v24 = vpop.f32.mrf.mxu0  ;;  %v1495_v26 = vpop.f32.mrf.mxu1  ;;  %v108_v9 = vunpack.c.l.bf16 %v2385_v8  ;;  %v109_v11 = vunpack.c.h.bf16 %v2385_v8 }
 0x214   :  { %v1494_v27 = vadd.f32 %v1493_v18, %v1381_v20  ;;  %v1383_v28 = vadd.f32 %v1382_v24, %v2659_v37  ;;  %1594 = vadd.xlane.f32.xlu0 %v1593_v21  ;;  %v2683_v30 = vadd.f32 %v1492_v19, %v101_v12  ;;  %v2386_v24 = vld [vmem:[#allocation2 + $0x38] sm:$0xff] }
 0x215   :  { %v1386_v31 = vpop.f32.mrf.mxu0  ;;  %v1499_v32 = vpop.f32.mrf.mxu1 }
 0x216   :  { %v1496_v33 = vadd.f32 %v1495_v26, %v1383_v28  ;;  %v1387_v43 = vadd.f32 %v1386_v31, %v2656_v42  ;;  %v1596_v35 = vadd.f32 %v2683_v30, %v2681_v29  ;;  %v2688_v45 = vadd.f32 %v1494_v27, %v102_v23 }
 0x217   :  { %v1388_v38 = vpop.f32.mrf.mxu0  ;;  %v1501_v40 = vpop.f32.mrf.mxu1  ;;  %v111_v27 = vunpack.c.h.bf16 %v2386_v24 }
 0x218   :  { %v2690_v46 = vadd.f32 %v1496_v33, %v103_v25  ;;  %v1500_v47 = vadd.f32 %v1499_v32, %v1387_v43  ;;  %v1389_v48 = vadd.f32 %v1388_v38, %v2659_v37  ;;  %1597 = vadd.xlane.f32.xlu1 %v1596_v35  ;;  %v110_v25 = vunpack.c.l.bf16 %v2386_v24 }
 0x219   :  { %v1390_v50 = vpop.f32.mrf.mxu0  ;;  %v1503_v51 = vpop.f32.mrf.mxu1 }
 0x21a   :  { %v1502_v52 = vadd.f32 %v1501_v40, %v1389_v48  ;;  %v1391_v53 = vadd.f32 %v1390_v50, %v2656_v42  ;;  %v1599_v54 = vadd.f32 %v2690_v46, %v2688_v45  ;;  %v2696_v60 = vadd.f32 %v1500_v47, %v104_v41  ;;  %v2387_v40 = vld [vmem:[#allocation2 + $0x40] sm:$0xff] }
 0x21b   :  { %v1392_v57 = vpop.f32.mrf.mxu0  ;;  %v1505_v59 = vpop.f32.mrf.mxu1  ;;  %v112_v47 = vunpack.c.l.bf16 %v2387_v40  ;;  %v113_v50 = vunpack.c.h.bf16 %v2387_v40 }
 0x21c   :  { %v2698_v62 = vadd.f32 %v1502_v52, %v105_v39  ;;  %v1504_v63 = vadd.f32 %v1503_v51, %v1391_v53  ;;  %v1393_v0 = vadd.f32 %v1392_v57, %v2659_v37  ;;  %1600 = vadd.xlane.f32.xlu1 %v1599_v54 }
 0x21d   :  { %v1396_v3 = vpop.f32.mrf.mxu0  ;;  %v1509_v4 = vpop.f32.mrf.mxu1 }
 0x21e   :  { %v1506_v5 = vadd.f32 %v1505_v59, %v1393_v0  ;;  %v1397_v6 = vadd.f32 %v1396_v3, %v2656_v42  ;;  %v1602_v7 = vadd.f32 %v2698_v62, %v2696_v60  ;;  %v2704_v15 = vadd.f32 %v1504_v63, %v106_v56  ;;  %v2388_v0 = vld [vmem:[#allocation2 + $0x48] sm:$0xff] }
 0x21f   :  { %v1398_v10 = vpop.f32.mrf.mxu0  ;;  %v1511_v12 = vpop.f32.mrf.mxu1  ;;  %v114_v3 = vunpack.c.l.bf16 %v2388_v0 }
 0x220   :  { %v2706_v16 = vadd.f32 %v1506_v5, %v107_v58  ;;  %v1510_v17 = vadd.f32 %v1509_v4, %v1397_v6  ;;  %v1399_v18 = vadd.f32 %v1398_v10, %v2659_v37  ;;  %1603 = vadd.xlane.f32.xlu0 %v1602_v7  ;;  %v115_v5 = vunpack.c.h.bf16 %v2388_v0  ;;  %v2390_v0 = vld [vmem:[#allocation2 + $0x60] sm:$0xff] }
 0x221   :  { %v1400_v19 = vpop.f32.mrf.mxu0  ;;  %v1513_v20 = vpop.f32.mrf.mxu1 }
 0x222   :  { %v1512_v21 = vadd.f32 %v1511_v12, %v1399_v18  ;;  %v1401_v22 = vadd.f32 %v1400_v19, %v2656_v42  ;;  %v1605_v23 = vadd.f32 %v2706_v16, %v2704_v15  ;;  %v2712_v31 = vadd.f32 %v1510_v17, %v108_v9 }
 0x223   :  { %v1402_v26 = vpop.f32.mrf.mxu0  ;;  %v1515_v28 = vpop.f32.mrf.mxu1 }
 0x224   :  { %v2714_v32 = vadd.f32 %v1512_v21, %v109_v11  ;;  %v1514_v33 = vadd.f32 %v1513_v20, %v1401_v22  ;;  %v1403_v43 = vadd.f32 %v1402_v26, %v2659_v37  ;;  %1606 = vadd.xlane.f32.xlu1 %v1605_v23  ;;  %v116_v20 = vunpack.c.l.bf16 %v2566_v49 }
 0x225   :  { %v1406_v35 = vpop.f32.mrf.mxu0  ;;  %v1519_v44 = vpop.f32.mrf.mxu1  ;;  %v117_v22 = vunpack.c.h.bf16 %v2566_v49 }
 0x226   :  { %v1516_v41 = vadd.f32 %v1515_v28, %v1403_v43  ;;  %v1407_v38 = vadd.f32 %v1406_v35, %v2656_v42  ;;  %v1608_v39 = vadd.f32 %v2714_v32, %v2712_v31  ;;  %v2720_v52 = vadd.f32 %v1514_v33, %v110_v25 }
 0x227   :  { %v1408_v48 = vpop.f32.mrf.mxu0  ;;  %v1521_v51 = vpop.f32.mrf.mxu1 }
 0x228   :  { %v2722_v53 = vadd.f32 %v1516_v41, %v111_v27  ;;  %v1520_v54 = vadd.f32 %v1519_v44, %v1407_v38  ;;  %v1409_v55 = vadd.f32 %v1408_v48, %v2659_v37  ;;  %1609 = vadd.xlane.f32.xlu0 %v1608_v39  ;;  %v2389_v41 = vld [vmem:[#allocation2 + $0x58] sm:$0xff] }
 0x229   :  { %v1410_v56 = vpop.f32.mrf.mxu0  ;;  %v1523_v57 = vpop.f32.mrf.mxu1  ;;  %v118_v38 = vunpack.c.l.bf16 %v2389_v41  ;;  %v119_v39 = vunpack.c.h.bf16 %v2389_v41 }
 0x22a   :  { %v1522_v58 = vadd.f32 %v1521_v51, %v1409_v55  ;;  %v1411_v59 = vadd.f32 %v1410_v56, %v2656_v42  ;;  %v1611_v63 = vadd.f32 %v2722_v53, %v2720_v52  ;;  %v2728_v7 = vadd.f32 %v1520_v54, %v112_v47 }
 0x22b   :  { %v1412_v4 = vpop.f32.mrf.mxu0  ;;  %v1525_v6 = vpop.f32.mrf.mxu1 }
 0x22c   :  { %v2730_v8 = vadd.f32 %v1522_v58, %v113_v50  ;;  %v1524_v9 = vadd.f32 %v1523_v57, %v1411_v59  ;;  %v1413_v10 = vadd.f32 %v1412_v4, %v2659_v37  ;;  %1612 = vadd.xlane.f32.xlu1 %v1611_v63  ;;  %v120_v59 = vunpack.c.l.bf16 %v2569_v61 }
 0x22d   :  { %v1416_v11 = vpop.f32.mrf.mxu0  ;;  %v1529_v12 = vpop.f32.mrf.mxu1 }
 0x22e   :  { %v1526_v17 = vadd.f32 %v1525_v6, %v1413_v10  ;;  %v1417_v18 = vadd.f32 %v1416_v11, %v2656_v42  ;;  %v1614_v19 = vadd.f32 %v2730_v8, %v2728_v7  ;;  %v2738_v24 = vadd.f32 %v1524_v9, %v114_v3 }
 0x22f   :  { %v1418_v21 = vpop.f32.mrf.mxu0  ;;  %v1531_v23 = vpop.f32.mrf.mxu1  ;;  %v121_v3 = vunpack.c.h.bf16 %v2390_v0 }
 0x230   :  { %v2740_v25 = vadd.f32 %v1526_v17, %v115_v5  ;;  %v1530_v26 = vadd.f32 %v1529_v12, %v1417_v18  ;;  %v1419_v27 = vadd.f32 %v1418_v21, %v2659_v37  ;;  %1615 = vadd.xlane.f32.xlu0 %v1614_v19  ;;  %v2391_v19 = vld [vmem:[#allocation2 + $0x68] sm:$0xff] }
 0x231   :  { %v1420_v28 = vpop.f32.mrf.mxu0  ;;  %v1533_v33 = vpop.f32.mrf.mxu1 }
 0x232   :  { %v1532_v43 = vadd.f32 %v1531_v23, %v1419_v27  ;;  %v1421_v35 = vadd.f32 %v1420_v28, %v2656_v42  ;;  %v1617_v44 = vadd.f32 %v2740_v25, %v2738_v24  ;;  %v2746_v47 = vadd.f32 %v1530_v26, %v116_v20 }
 0x233   :  { %v1422_v49 = vpop.f32.mrf.mxu0  ;;  %v1535_v40 = vpop.f32.mrf.mxu1  ;;  %v122_v20 = vunpack.c.l.bf16 %v2391_v19 }
 0x234   :  { %v2748_v48 = vadd.f32 %v1532_v43, %v117_v22  ;;  %v1534_v50 = vadd.f32 %v1533_v33, %v1421_v35  ;;  %v1423_v51 = vadd.f32 %v1422_v49, %v2659_v37  ;;  %1618 = vadd.xlane.f32.xlu1 %v1617_v44  ;;  %v123_v22 = vunpack.c.h.bf16 %v2391_v19  ;;  %v2392_v49 = vld [vmem:[#allocation2 + $0x70] sm:$0xff] }
 0x235   :  { %v1426_v54 = vpop.f32.mrf.mxu0  ;;  %v1539_v55 = vpop.f32.mrf.mxu1 }
 0x236   :  { %v1536_v56 = vadd.f32 %v1535_v40, %v1423_v51  ;;  %v1427_v57 = vadd.f32 %v1426_v54, %v2656_v42  ;;  %v1620_v58 = vadd.f32 %v2748_v48, %v2746_v47  ;;  %v2755_v5 = vadd.f32 %v1534_v50, %v118_v38 }
 0x237   :  { %v1428_v63 = vpop.f32.mrf.mxu0  ;;  %v1541_v4 = vpop.f32.mrf.mxu1  ;;  %v125_v50 = vunpack.c.h.bf16 %v2392_v49 }
 0x238   :  { %v2757_v6 = vadd.f32 %v1536_v56, %v119_v39  ;;  %v1540_v9 = vadd.f32 %v1539_v55, %v1427_v57  ;;  %v1429_v10 = vadd.f32 %v1428_v63, %v2659_v37  ;;  %1621 = vadd.xlane.f32.xlu0 %v1620_v58  ;;  %v124_v39 = vunpack.c.l.bf16 %v2392_v49 }
 0x239   :  { %v1430_v11 = vpop.f32.mrf.mxu0  ;;  %v1543_v12 = vpop.f32.mrf.mxu1 }
 0x23a   :  { %v1542_v17 = vadd.f32 %v1541_v4, %v1429_v10  ;;  %v1431_v18 = vadd.f32 %v1430_v11, %v2656_v42  ;;  %v1623_v61 = vadd.f32 %v2757_v6, %v2755_v5  ;;  %v2763_v26 = vadd.f32 %v1540_v9, %v120_v59  ;;  %v2393_v4 = vld [vmem:[#allocation2 + $0x78] sm:$0xff] }
 0x23b   :  { %v1432_v21 = vpop.f32.mrf.mxu0  ;;  %v1545_v23 = vpop.f32.mrf.mxu1  ;;  %v126_v9 = vunpack.c.l.bf16 %v2393_v4  ;;  %v127_v11 = vunpack.c.h.bf16 %v2393_v4 }
 0x23c   :  { %v2765_v27 = vadd.f32 %v1542_v17, %v121_v3  ;;  %v1544_v28 = vadd.f32 %v1543_v12, %v1431_v18  ;;  %v1433_v33 = vadd.f32 %v1432_v21, %v2659_v37  ;;  %1624 = vadd.xlane.f32.xlu1 %v1623_v61 }
 0x23d   :  { %v1436_v43 = vpop.f32.mrf.mxu0  ;;  %v1549_v35 = vpop.f32.mrf.mxu1 }
 0x23e   :  { %v1546_v44 = vadd.f32 %v1545_v23, %v1433_v33  ;;  %v1437_v41 = vadd.f32 %v1436_v43, %v2656_v42  ;;  %v1626_v38 = vadd.f32 %v2765_v27, %v2763_v26  ;;  %v2771_v54 = vadd.f32 %v1544_v28, %v122_v20 }
 0x23f   :  { %v1438_v40 = vpop.f32.mrf.mxu0  ;;  %v1551_v51 = vpop.f32.mrf.mxu1 }
 0x240   :  { %v2773_v55 = vadd.f32 %v1546_v44, %v123_v22  ;;  %v1550_v56 = vadd.f32 %v1549_v35, %v1437_v41  ;;  %v1439_v57 = vadd.f32 %v1438_v40, %v2659_v37  ;;  %1627 = vadd.xlane.f32.xlu0 %v1626_v38 }
 0x241   :  { %v1440_v58 = vpop.f32.mrf.mxu0  ;;  %v1553_v59 = vpop.f32.mrf.mxu1 }
 0x242   :  { %v1552_v63 = vadd.f32 %v1551_v51, %v1439_v57  ;;  %v1441_v0 = vadd.f32 %v1440_v58, %v2656_v42  ;;  %v1629_v3 = vadd.f32 %v2773_v55, %v2771_v54  ;;  %v2779_v12 = vadd.f32 %v1550_v56, %v124_v39 }
 0x243   :  { %v1442_v10 = vpop.f32.mrf.mxu0  ;;  %v1555_v19 = vpop.f32.mrf.mxu1 }
 0x244   :  { %v2781_v17 = vadd.f32 %v1552_v63, %v125_v50  ;;  %v1554_v18 = vadd.f32 %v1553_v59, %v1441_v0  ;;  %v1443_v61 = vadd.f32 %v1442_v10, %v2659_v37  ;;  %1630 = vadd.xlane.f32.xlu1 %v1629_v3 }
 0x246   :  { %v1556_v20 = vadd.f32 %v1555_v19, %v1443_v61  ;;  %v1632_v42 = vadd.f32 %v2781_v17, %v2779_v12  ;;  %v2786_v21 = vadd.f32 %v1554_v18, %v126_v9 }
 0x248   :  { %v2788_v22 = vadd.f32 %v1556_v20, %v127_v11  ;;  %1633 = vadd.xlane.f32.xlu0 %v1632_v42 }
 0x24a   :  { %v1635_v23 = vadd.f32 %v2788_v22, %v2786_v21 }
 0x24c   :  { %1636 = vadd.xlane.f32.xlu1 %v1635_v23 }
 0x299   :  { %v1592_v28 = vpop.xlane.xlu0 %1591 }
 0x29a   :  { %v1639_v33 = vmul.f32 0.00390625, %v1592_v28 }
 0x29c   :  { %v2793_v43 = vsub.f32 %v2665_v1, %v1639_v33  ;;  %v2796_v37 = vsub.f32 %v2667_v2, %v1639_v33 }
 0x29d   :  { %v1595_v35 = vpop.xlane.xlu0 %1594 }
 0x29e   :  { %v1640_v44 = vmul.f32 0.00390625, %v1595_v35  ;;  %v1687_v41 = vmul.f32 %v2793_v43, %v2793_v43  ;;  %v1688_v38 = vmul.f32 %v2796_v37, %v2796_v37 }
 0x2a0   :  { %v2803_v49 = vsub.f32 %v2672_v13, %v1640_v44  ;;  %v2806_v39 = vsub.f32 %v2674_v14, %v1640_v44  ;;  %v1719_v40 = vadd.f32 %v1688_v38, %v1687_v41 }
 0x2a1   :  { %v1598_v1 = vpop.xlane.xlu1 %1597 }
 0x2a2   :  { %v1641_v50 = vmul.f32 0.00390625, %v1598_v1  ;;  %1720 = vadd.xlane.f32.xlu0 %v1719_v40  ;;  %v1689_v2 = vmul.f32 %v2803_v49, %v2803_v49  ;;  %v1690_v51 = vmul.f32 %v2806_v39, %v2806_v39 }
 0x2a4   :  { %v2813_v56 = vsub.f32 %v2681_v29, %v1641_v50  ;;  %v2816_v57 = vsub.f32 %v2683_v30, %v1641_v50  ;;  %v1722_v13 = vadd.f32 %v1690_v51, %v1689_v2 }
 0x2a5   :  { %v1601_v58 = vpop.xlane.xlu1 %1600 }
 0x2a6   :  { %v1642_v14 = vmul.f32 0.00390625, %v1601_v58  ;;  %1723 = vadd.xlane.f32.xlu1 %v1722_v13  ;;  %v1691_v59 = vmul.f32 %v2813_v56, %v2813_v56  ;;  %v1692_v63 = vmul.f32 %v2816_v57, %v2816_v57 }
 0x2a8   :  { %v2823_v0 = vsub.f32 %v2688_v45, %v1642_v14  ;;  %v2826_v3 = vsub.f32 %v2690_v46, %v1642_v14  ;;  %v1725_v29 = vadd.f32 %v1692_v63, %v1691_v59 }
 0x2a9   :  { %v1604_v4 = vpop.xlane.xlu0 %1603 }
 0x2aa   :  { %v1643_v30 = vmul.f32 0.00390625, %v1604_v4  ;;  %1726 = vadd.xlane.f32.xlu0 %v1725_v29  ;;  %v1693_v9 = vmul.f32 %v2823_v0, %v2823_v0  ;;  %v1694_v10 = vmul.f32 %v2826_v3, %v2826_v3 }
 0x2ac   :  { %v2833_v11 = vsub.f32 %v2696_v60, %v1643_v30  ;;  %v2836_v18 = vsub.f32 %v2698_v62, %v1643_v30  ;;  %v1728_v45 = vadd.f32 %v1694_v10, %v1693_v9 }
 0x2ad   :  { %v1607_v61 = vpop.xlane.xlu1 %1606 }
 0x2ae   :  { %v1644_v46 = vmul.f32 0.00390625, %v1607_v61  ;;  %1729 = vadd.xlane.f32.xlu1 %v1728_v45  ;;  %v1695_v19 = vmul.f32 %v2833_v11, %v2833_v11  ;;  %v1696_v20 = vmul.f32 %v2836_v18, %v2836_v18 }
 0x2b0   :  { %v2843_v42 = vsub.f32 %v2704_v15, %v1644_v46  ;;  %v2846_v23 = vsub.f32 %v2706_v16, %v1644_v46  ;;  %v1731_v60 = vadd.f32 %v1696_v20, %v1695_v19 }
 0x2b1   :  { %v1610_v28 = vpop.xlane.xlu0 %1609 }
 0x2b2   :  { %v1645_v62 = vmul.f32 0.00390625, %v1610_v28  ;;  %1732 = vadd.xlane.f32.xlu0 %v1731_v60  ;;  %v1697_v33 = vmul.f32 %v2843_v42, %v2843_v42  ;;  %v1698_v35 = vmul.f32 %v2846_v23, %v2846_v23 }
 0x2b4   :  { %v2853_v44 = vsub.f32 %v2712_v31, %v1645_v62  ;;  %v2856_v41 = vsub.f32 %v2714_v32, %v1645_v62  ;;  %v1734_v15 = vadd.f32 %v1698_v35, %v1697_v33 }
 0x2b5   :  { %v1613_v38 = vpop.xlane.xlu1 %1612 }
 0x2b6   :  { %v1646_v16 = vmul.f32 0.00390625, %v1613_v38  ;;  %1735 = vadd.xlane.f32.xlu1 %v1734_v15  ;;  %v1699_v40 = vmul.f32 %v2853_v44, %v2853_v44  ;;  %v1700_v1 = vmul.f32 %v2856_v41, %v2856_v41 }
 0x2b8   :  { %v2863_v50 = vsub.f32 %v2720_v52, %v1646_v16  ;;  %v2866_v2 = vsub.f32 %v2722_v53, %v1646_v16  ;;  %v1737_v31 = vadd.f32 %v1700_v1, %v1699_v40 }
 0x2b9   :  { %v1616_v51 = vpop.xlane.xlu0 %1615 }
 0x2ba   :  { %v1647_v32 = vmul.f32 0.00390625, %v1616_v51  ;;  %1738 = vadd.xlane.f32.xlu0 %v1737_v31  ;;  %v1701_v13 = vmul.f32 %v2863_v50, %v2863_v50  ;;  %v1702_v58 = vmul.f32 %v2866_v2, %v2866_v2 }
 0x2bc   :  { %v2873_v14 = vsub.f32 %v2728_v7, %v1647_v32  ;;  %v2876_v59 = vsub.f32 %v2730_v8, %v1647_v32  ;;  %v1740_v52 = vadd.f32 %v1702_v58, %v1701_v13 }
 0x2bd   :  { %v1619_v63 = vpop.xlane.xlu1 %1618 }
 0x2be   :  { %v1648_v53 = vmul.f32 0.00390625, %v1619_v63  ;;  %1741 = vadd.xlane.f32.xlu1 %v1740_v52  ;;  %v1703_v29 = vmul.f32 %v2873_v14, %v2873_v14  ;;  %v1704_v4 = vmul.f32 %v2876_v59, %v2876_v59 }
 0x2c0   :  { %v2883_v30 = vsub.f32 %v2738_v24, %v1648_v53  ;;  %v2886_v9 = vsub.f32 %v2740_v25, %v1648_v53  ;;  %v1743_v7 = vadd.f32 %v1704_v4, %v1703_v29 }
 0x2c1   :  { %v1622_v10 = vpop.xlane.xlu0 %1621 }
 0x2c2   :  { %v1649_v8 = vmul.f32 0.00390625, %v1622_v10  ;;  %1744 = vadd.xlane.f32.xlu0 %v1743_v7  ;;  %v1705_v45 = vmul.f32 %v2883_v30, %v2883_v30  ;;  %v1706_v61 = vmul.f32 %v2886_v9, %v2886_v9 }
 0x2c4   :  { %v2893_v46 = vsub.f32 %v2746_v47, %v1649_v8  ;;  %v2896_v19 = vsub.f32 %v2748_v48, %v1649_v8  ;;  %v1746_v24 = vadd.f32 %v1706_v61, %v1705_v45 }
 0x2c5   :  { %v1625_v20 = vpop.xlane.xlu1 %1624 }
 0x2c6   :  { %v1650_v25 = vmul.f32 0.00390625, %v1625_v20  ;;  %1747 = vadd.xlane.f32.xlu1 %v1746_v24  ;;  %v1707_v60 = vmul.f32 %v2893_v46, %v2893_v46  ;;  %v1708_v28 = vmul.f32 %v2896_v19, %v2896_v19 }
 0x2c8   :  { %v2903_v62 = vsub.f32 %v2755_v5, %v1650_v25  ;;  %v2906_v33 = vsub.f32 %v2757_v6, %v1650_v25  ;;  %v1749_v47 = vadd.f32 %v1708_v28, %v1707_v60 }
 0x2c9   :  { %v1628_v35 = vpop.xlane.xlu0 %1627 }
 0x2ca   :  { %v1651_v48 = vmul.f32 0.00390625, %v1628_v35  ;;  %1750 = vadd.xlane.f32.xlu0 %v1749_v47  ;;  %v1709_v15 = vmul.f32 %v2903_v62, %v2903_v62  ;;  %v1710_v38 = vmul.f32 %v2906_v33, %v2906_v33 }
 0x2cc   :  { %v2913_v16 = vsub.f32 %v2763_v26, %v1651_v48  ;;  %v2916_v40 = vsub.f32 %v2765_v27, %v1651_v48  ;;  %v1752_v5 = vadd.f32 %v1710_v38, %v1709_v15 }
 0x2cd   :  { %v1631_v1 = vpop.xlane.xlu1 %1630 }
 0x2ce   :  { %v1652_v6 = vmul.f32 0.00390625, %v1631_v1  ;;  %1753 = vadd.xlane.f32.xlu1 %v1752_v5  ;;  %v1711_v31 = vmul.f32 %v2913_v16, %v2913_v16  ;;  %v1712_v51 = vmul.f32 %v2916_v40, %v2916_v40  ;;  %v1847_v5 = vld [vmem:[%s3077_s5] sm:$0x3] }
 0x2cf   :  { %v1891_v1 = vld [vmem:[%s3078_s6] sm:$0x3] }
 0x2d0   :  { %v2923_v32 = vsub.f32 %v2771_v54, %v1652_v6  ;;  %v2926_v13 = vsub.f32 %v2773_v55, %v1652_v6  ;;  %v1755_v26 = vadd.f32 %v1712_v51, %v1711_v31  ;;  %v2959_v51 = vrot.slane %v1847_v5, %v2576_v36 }
 0x2d1   :  { %v1634_v58 = vpop.xlane.xlu0 %1633 }
 0x2d2   :  { %v1653_v27 = vmul.f32 0.00390625, %v1634_v58  ;;  %1756 = vadd.xlane.f32.xlu0 %v1755_v26  ;;  %v1713_v52 = vmul.f32 %v2923_v32, %v2923_v32  ;;  %v1714_v63 = vmul.f32 %v2926_v13, %v2926_v13  ;;  %v2962_v26 = vrot.slane %v1847_v5, %v2574_v34 }
 0x2d4   :  { %v2933_v53 = vsub.f32 %v2779_v12, %v1653_v27  ;;  %v2936_v29 = vsub.f32 %v2781_v17, %v1653_v27  ;;  %v1758_v54 = vadd.f32 %v1714_v63, %v1713_v52  ;;  %v2965_v52 = vrot.slane %v1891_v1, %v2576_v36 }
 0x2d5   :  { %v1637_v4 = vpop.xlane.xlu1 %1636  ;;  %v2968_v63 = vrot.slane %v1891_v1, %v2574_v34 }
 0x2d6   :  { %v1654_v55 = vmul.f32 0.00390625, %v1637_v4  ;;  %1759 = vadd.xlane.f32.xlu1 %v1758_v54  ;;  %v1715_v7 = vmul.f32 %v2933_v53, %v2933_v53  ;;  %v1716_v10 = vmul.f32 %v2936_v29, %v2936_v29 }
 0x2d8   :  { %v2943_v8 = vsub.f32 %v2786_v21, %v1654_v55  ;;  %v2946_v45 = vsub.f32 %v2788_v22, %v1654_v55  ;;  %v1761_v12 = vadd.f32 %v1716_v10, %v1715_v7 }
 0x2da   :  { %1762 = vadd.xlane.f32.xlu0 %v1761_v12  ;;  %v1717_v17 = vmul.f32 %v2943_v8, %v2943_v8  ;;  %v1718_v61 = vmul.f32 %v2946_v45, %v2946_v45 }
 0x2dc   :  { %v1764_v24 = vadd.f32 %v1718_v61, %v1717_v17 }
 0x2de   :  { %1765 = vadd.xlane.f32.xlu1 %v1764_v24 }
 0x32b   :  { %v1721_v20 = vpop.xlane.xlu0 %1720 }
 0x32c   :  { %v1767_v25 = vmul.f32 0.00390625, %v1721_v20 }
 0x32e   :  { %v1783_v60 = vadd.f32 1e-06, %v1767_v25 }
 0x32f   :  { %v1724_v28 = vpop.xlane.xlu1 %1723 }
 0x330   :  { %2347 = vrsqrt.f32 %v1783_v60  ;;  %v1768_v21 = vmul.f32 0.00390625, %v1724_v28 }
 0x332   :  { %v1784_v47 = vadd.f32 1e-06, %v1768_v21 }
 0x333   :  { %v1727_v35 = vpop.xlane.xlu0 %1726 }
 0x334   :  { %2349 = vrsqrt.f32 %v1784_v47  ;;  %v1769_v22 = vmul.f32 0.00390625, %v1727_v35 }
 0x336   :  { %v1785_v48 = vadd.f32 1e-06, %v1769_v22 }
 0x337   :  { %v1730_v15 = vpop.xlane.xlu1 %1729 }
 0x338   :  { %2351 = vrsqrt.f32 %v1785_v48  ;;  %v1770_v38 = vmul.f32 0.00390625, %v1730_v15 }
 0x33a   :  { %v1786_v6 = vadd.f32 1e-06, %v1770_v38 }
 0x33b   :  { %v1733_v31 = vpop.xlane.xlu0 %1732 }
 0x33c   :  { %2353 = vrsqrt.f32 %v1786_v6  ;;  %v1771_v58 = vmul.f32 0.00390625, %v1733_v31 }
 0x33d   :  { %v2348_v27 = vpop.eup %2347 }
 0x33e   :  { %v1815_v54 = vmul.f32 %v2348_v27, %v2793_v43  ;;  %v1816_v4 = vmul.f32 %v2348_v27, %v2796_v37  ;;  %v1787_v55 = vadd.f32 1e-06, %v1771_v58 }
 0x33f   :  { %v1736_v7 = vpop.xlane.xlu1 %1735 }
 0x340   :  { %v1859_v10 = vmul.f32 %v2959_v51, %v1815_v54  ;;  %v1860_v12 = vmul.f32 %v2962_v26, %v1816_v4  ;;  %2355 = vrsqrt.f32 %v1787_v55  ;;  %v1772_v17 = vmul.f32 0.00390625, %v1736_v7 }
 0x341   :  { %v2350_v61 = vpop.eup %2349 }
 0x342   :  { %v1903_v24 = vadd.f32 %v2965_v52, %v1859_v10  ;;  %v1904_v36 = vadd.f32 %v2968_v63, %v1860_v12  ;;  %v1817_v34 = vmul.f32 %v2350_v61, %v2803_v49  ;;  %v1818_v20 = vmul.f32 %v2350_v61, %v2806_v39 }
 0x343   :  { %v1788_v43 = vadd.f32 1e-06, %v1772_v17  ;;  %v1739_v25 = vpop.xlane.xlu0 %1738 }
 0x344   :  { %1935 = vst [vmem:[#allocation10] sm:$0xff] %v1903_v24  ;;  %1936 = vst [vmem:[#allocation10 + $0x8] sm:$0xff] %v1904_v36  ;;  %v1861_v37 = vmul.f32 %v2959_v51, %v1817_v34  ;;  %v1862_v60 = vmul.f32 %v2962_v26, %v1818_v20  ;;  %v1773_v28 = vmul.f32 0.00390625, %v1739_v25 }
 0x345   :  { %v2352_v21 = vpop.eup %2351  ;;  %2357 = vrsqrt.f32 %v1788_v43 }
 0x346   :  { %v1905_v47 = vadd.f32 %v2965_v52, %v1861_v37  ;;  %v1906_v35 = vadd.f32 %v2968_v63, %v1862_v60  ;;  %v1819_v22 = vmul.f32 %v2352_v21, %v2813_v56  ;;  %v1820_v49 = vmul.f32 %v2352_v21, %v2816_v57 }
 0x347   :  { %v1789_v39 = vadd.f32 1e-06, %v1773_v28  ;;  %v1742_v48 = vpop.xlane.xlu1 %1741 }
 0x348   :  { %1937 = vst [vmem:[#allocation10 + $0x10] sm:$0xff] %v1905_v47  ;;  %1938 = vst [vmem:[#allocation10 + $0x18] sm:$0xff] %v1906_v35  ;;  %v1863_v15 = vmul.f32 %v2959_v51, %v1819_v22  ;;  %v1864_v38 = vmul.f32 %v2962_v26, %v1820_v49  ;;  %v1774_v5 = vmul.f32 0.00390625, %v1742_v48 }
 0x349   :  { %v2354_v1 = vpop.eup %2353  ;;  %2359 = vrsqrt.f32 %v1789_v39 }
 0x34a   :  { %v1907_v6 = vadd.f32 %v2965_v52, %v1863_v15  ;;  %v1908_v31 = vadd.f32 %v2968_v63, %v1864_v38  ;;  %v1821_v58 = vmul.f32 %v2354_v1, %v2823_v0  ;;  %v1822_v56 = vmul.f32 %v2354_v1, %v2826_v3 }
 0x34b   :  { %v1790_v57 = vadd.f32 1e-06, %v1774_v5  ;;  %v1745_v27 = vpop.xlane.xlu0 %1744 }
 0x34c   :  { %1939 = vst [vmem:[#allocation10 + $0x20] sm:$0xff] %v1907_v6  ;;  %1940 = vst [vmem:[#allocation10 + $0x28] sm:$0xff] %v1908_v31  ;;  %v1865_v54 = vmul.f32 %v2959_v51, %v1821_v58  ;;  %v1866_v4 = vmul.f32 %v2962_v26, %v1822_v56  ;;  %v1775_v55 = vmul.f32 0.00390625, %v1745_v27 }
 0x34d   :  { %v2356_v7 = vpop.eup %2355  ;;  %2361 = vrsqrt.f32 %v1790_v57 }
 0x34e   :  { %v1909_v10 = vadd.f32 %v2965_v52, %v1865_v54  ;;  %v1910_v12 = vadd.f32 %v2968_v63, %v1866_v4  ;;  %v1823_v17 = vmul.f32 %v2356_v7, %v2833_v11  ;;  %v1824_v0 = vmul.f32 %v2356_v7, %v2836_v18 }
 0x34f   :  { %v1791_v3 = vadd.f32 1e-06, %v1775_v55  ;;  %v1748_v61 = vpop.xlane.xlu1 %1747 }
 0x350   :  { %1941 = vst [vmem:[#allocation10 + $0x30] sm:$0xff] %v1909_v10  ;;  %1942 = vst [vmem:[#allocation10 + $0x38] sm:$0xff] %v1910_v12  ;;  %v1867_v24 = vmul.f32 %v2959_v51, %v1823_v17  ;;  %v1868_v36 = vmul.f32 %v2962_v26, %v1824_v0  ;;  %v1776_v34 = vmul.f32 0.00390625, %v1748_v61 }
 0x351   :  { %2363 = vrsqrt.f32 %v1791_v3 }
 0x352   :  { %v2358_v20 = vpop.eup %2357  ;;  %v1911_v43 = vadd.f32 %v2965_v52, %v1867_v24  ;;  %v1912_v25 = vadd.f32 %v2968_v63, %v1868_v36  ;;  %v1792_v37 = vadd.f32 1e-06, %v1776_v34 }
 0x353   :  { %v1825_v11 = vmul.f32 %v2358_v20, %v2843_v42  ;;  %v1826_v18 = vmul.f32 %v2358_v20, %v2846_v23  ;;  %v1751_v60 = vpop.xlane.xlu0 %1750 }
 0x354   :  { %1943 = vst [vmem:[#allocation10 + $0x40] sm:$0xff] %v1911_v43  ;;  %1944 = vst [vmem:[#allocation10 + $0x48] sm:$0xff] %v1912_v25  ;;  %2365 = vrsqrt.f32 %v1792_v37  ;;  %v1777_v28 = vmul.f32 0.00390625, %v1751_v60 }
 0x355   :  { %v1869_v21 = vmul.f32 %v2959_v51, %v1825_v11  ;;  %v1870_v47 = vmul.f32 %v2962_v26, %v1826_v18 }
 0x356   :  { %v2360_v35 = vpop.eup %2359  ;;  %v1793_v22 = vadd.f32 1e-06, %v1777_v28 }
 0x357   :  { %v1913_v49 = vadd.f32 %v2965_v52, %v1869_v21  ;;  %v1914_v39 = vadd.f32 %v2968_v63, %v1870_v47  ;;  %v1827_v48 = vmul.f32 %v2360_v35, %v2853_v44  ;;  %v1828_v42 = vmul.f32 %v2360_v35, %v2856_v41  ;;  %v1754_v23 = vpop.xlane.xlu1 %1753 }
 0x358   :  { %2367 = vrsqrt.f32 %v1793_v22  ;;  %v1778_v15 = vmul.f32 0.00390625, %v1754_v23 }
 0x359   :  { %1945 = vst [vmem:[#allocation10 + $0x50] sm:$0xff] %v1913_v49  ;;  %1946 = vst [vmem:[#allocation10 + $0x58] sm:$0xff] %v1914_v39  ;;  %v1871_v38 = vmul.f32 %v2959_v51, %v1827_v48  ;;  %v1872_v5 = vmul.f32 %v2962_v26, %v1828_v42 }
 0x35a   :  { %v2362_v1 = vpop.eup %2361  ;;  %v1794_v6 = vadd.f32 1e-06, %v1778_v15 }
 0x35b   :  { %v1915_v31 = vadd.f32 %v2965_v52, %v1871_v38  ;;  %v1916_v58 = vadd.f32 %v2968_v63, %v1872_v5  ;;  %v1829_v56 = vmul.f32 %v2362_v1, %v2863_v50  ;;  %v1830_v44 = vmul.f32 %v2362_v1, %v2866_v2  ;;  %v1757_v41 = vpop.xlane.xlu0 %1756 }
 0x35c   :  { %2369 = vrsqrt.f32 %v1794_v6  ;;  %v1779_v57 = vmul.f32 0.00390625, %v1757_v41 }
 0x35d   :  { %1947 = vst [vmem:[#allocation10 + $0x60] sm:$0xff] %v1915_v31  ;;  %1948 = vst [vmem:[#allocation10 + $0x68] sm:$0xff] %v1916_v58  ;;  %v1873_v27 = vmul.f32 %v2959_v51, %v1829_v56  ;;  %v1874_v54 = vmul.f32 %v2962_v26, %v1830_v44 }
 0x35e   :  { %v2364_v4 = vpop.eup %2363  ;;  %v1795_v55 = vadd.f32 1e-06, %v1779_v57 }
 0x35f   :  { %v1917_v7 = vadd.f32 %v2965_v52, %v1873_v27  ;;  %v1918_v10 = vadd.f32 %v2968_v63, %v1874_v54  ;;  %v1831_v12 = vmul.f32 %v2364_v4, %v2873_v14  ;;  %v1832_v50 = vmul.f32 %v2364_v4, %v2876_v59  ;;  %v1760_v2 = vpop.xlane.xlu1 %1759 }
 0x360   :  { %2371 = vrsqrt.f32 %v1795_v55  ;;  %v1780_v17 = vmul.f32 0.00390625, %v1760_v2 }
 0x361   :  { %v2366_v0 = vpop.eup %2365  ;;  %1949 = vst [vmem:[#allocation10 + $0x70] sm:$0xff] %v1917_v7  ;;  %1950 = vst [vmem:[#allocation10 + $0x78] sm:$0xff] %v1918_v10  ;;  %v1875_v3 = vmul.f32 %v2959_v51, %v1831_v12  ;;  %v1876_v61 = vmul.f32 %v2962_v26, %v1832_v50 }
 0x362   :  { %v1833_v24 = vmul.f32 %v2366_v0, %v2883_v30  ;;  %v1834_v36 = vmul.f32 %v2366_v0, %v2886_v9  ;;  %v1796_v34 = vadd.f32 1e-06, %v1780_v17 }
 0x363   :  { %v1919_v20 = vadd.f32 %v2965_v52, %v1875_v3  ;;  %v1920_v14 = vadd.f32 %v2968_v63, %v1876_v61  ;;  %v1763_v59 = vpop.xlane.xlu0 %1762 }
 0x364   :  { %v1877_v43 = vmul.f32 %v2959_v51, %v1833_v24  ;;  %v1878_v25 = vmul.f32 %v2962_v26, %v1834_v36  ;;  %2373 = vrsqrt.f32 %v1796_v34  ;;  %v1781_v37 = vmul.f32 0.00390625, %v1763_v59 }
 0x365   :  { %v2368_v11 = vpop.eup %2367  ;;  %1951 = vst [vmem:[#allocation10 + $0x80] sm:$0xff] %v1919_v20  ;;  %1952 = vst [vmem:[#allocation10 + $0x88] sm:$0xff] %v1920_v14 }
 0x366   :  { %v1921_v18 = vadd.f32 %v2965_v52, %v1877_v43  ;;  %v1922_v30 = vadd.f32 %v2968_v63, %v1878_v25  ;;  %v1835_v9 = vmul.f32 %v2368_v11, %v2893_v46  ;;  %v1836_v60 = vmul.f32 %v2368_v11, %v2896_v19 }
 0x367   :  { %v1797_v28 = vadd.f32 1e-06, %v1781_v37  ;;  %v1766_v21 = vpop.xlane.xlu1 %1765 }
 0x368   :  { %1953 = vst [vmem:[#allocation10 + $0x90] sm:$0xff] %v1921_v18  ;;  %1954 = vst [vmem:[#allocation10 + $0x98] sm:$0xff] %v1922_v30  ;;  %v1879_v47 = vmul.f32 %v2959_v51, %v1835_v9  ;;  %v1880_v35 = vmul.f32 %v2962_v26, %v1836_v60  ;;  %v1782_v22 = vmul.f32 0.00390625, %v1766_v21 }
 0x369   :  { %v2370_v49 = vpop.eup %2369  ;;  %2375 = vrsqrt.f32 %v1797_v28 }
 0x36a   :  { %v1923_v39 = vadd.f32 %v2965_v52, %v1879_v47  ;;  %v1924_v48 = vadd.f32 %v2968_v63, %v1880_v35  ;;  %v1837_v42 = vmul.f32 %v2370_v49, %v2903_v62  ;;  %v1838_v46 = vmul.f32 %v2370_v49, %v2906_v33 }
 0x36b   :  { %v1798_v19 = vadd.f32 1e-06, %v1782_v22 }
 0x36c   :  { %1955 = vst [vmem:[#allocation10 + $0xa0] sm:$0xff] %v1923_v39  ;;  %1956 = vst [vmem:[#allocation10 + $0xa8] sm:$0xff] %v1924_v48  ;;  %v1881_v23 = vmul.f32 %v2959_v51, %v1837_v42  ;;  %v1882_v15 = vmul.f32 %v2962_v26, %v1838_v46 }
 0x36d   :  { %v2372_v38 = vpop.eup %2371  ;;  %2377 = vrsqrt.f32 %v1798_v19 }
 0x36e   :  { %v1925_v5 = vadd.f32 %v2965_v52, %v1881_v23  ;;  %v1926_v1 = vadd.f32 %v2968_v63, %v1882_v15  ;;  %v1839_v6 = vmul.f32 %v2372_v38, %v2913_v16  ;;  %v1840_v31 = vmul.f32 %v2372_v38, %v2916_v40 }
 0x370   :  { %1957 = vst [vmem:[#allocation10 + $0xb0] sm:$0xff] %v1925_v5  ;;  %1958 = vst [vmem:[#allocation10 + $0xb8] sm:$0xff] %v1926_v1  ;;  %v1883_v62 = vmul.f32 %v2959_v51, %v1839_v6  ;;  %v1884_v33 = vmul.f32 %v2962_v26, %v1840_v31 }
 0x371   :  { %v2374_v58 = vpop.eup %2373 }
 0x372   :  { %v1927_v56 = vadd.f32 %v2965_v52, %v1883_v62  ;;  %v1928_v44 = vadd.f32 %v2968_v63, %v1884_v33  ;;  %v1841_v41 = vmul.f32 %v2374_v58, %v2923_v32  ;;  %v1842_v57 = vmul.f32 %v2374_v58, %v2926_v13 }
 0x374   :  { %1959 = vst [vmem:[#allocation10 + $0xc0] sm:$0xff] %v1927_v56  ;;  %1960 = vst [vmem:[#allocation10 + $0xc8] sm:$0xff] %v1928_v44  ;;  %v1885_v16 = vmul.f32 %v2959_v51, %v1841_v41  ;;  %v1886_v40 = vmul.f32 %v2962_v26, %v1842_v57 }
 0x376   :  { %v2376_v27 = vpop.eup %2375  ;;  %v1929_v54 = vadd.f32 %v2965_v52, %v1885_v16  ;;  %v1930_v4 = vadd.f32 %v2968_v63, %v1886_v40 }
 0x377   :  { %v1843_v55 = vmul.f32 %v2376_v27, %v2933_v53  ;;  %v1844_v7 = vmul.f32 %v2376_v27, %v2936_v29 }
 0x378   :  { %1961 = vst [vmem:[#allocation10 + $0xd0] sm:$0xff] %v1929_v54  ;;  %1962 = vst [vmem:[#allocation10 + $0xd8] sm:$0xff] %v1930_v4 }
 0x379   :  { %v1887_v32 = vmul.f32 %v2959_v51, %v1843_v55  ;;  %v1888_v13 = vmul.f32 %v2962_v26, %v1844_v7 }
 0x37a   :  { %v2378_v10 = vpop.eup %2377 }
 0x37b   :  { %v1931_v12 = vadd.f32 %v2965_v52, %v1887_v32  ;;  %v1932_v50 = vadd.f32 %v2968_v63, %v1888_v13  ;;  %v1845_v2 = vmul.f32 %v2378_v10, %v2943_v8  ;;  %v1846_v17 = vmul.f32 %v2378_v10, %v2946_v45 }
 0x37d   :  { %1963 = vst [vmem:[#allocation10 + $0xe0] sm:$0xff] %v1931_v12  ;;  %1964 = vst [vmem:[#allocation10 + $0xe8] sm:$0xff] %v1932_v50  ;;  %v1889_v53 = vmul.f32 %v2959_v51, %v1845_v2  ;;  %v1890_v29 = vmul.f32 %v2962_v26, %v1846_v17 }
 0x37f   :  { %v1933_v0 = vadd.f32 %v2965_v52, %v1889_v53  ;;  %v1934_v3 = vadd.f32 %v2968_v63, %v1890_v29 }
 0x381   :  { %1965 = vst [vmem:[#allocation10 + $0xf0] sm:$0xff] %v1933_v0  ;;  %1966 = vst [vmem:[#allocation10 + $0xf8] sm:$0xff] %v1934_v3 }
 0x382   :  { %1971 = vsyncadd [#allocation4], 768  ;;  %s2510_s5 = smov [#allocation10]  }
 0x383   :  { %s1972_s6 = sshll.u32 %s2510_s5, 4  ;;  %s1973_s6 = int_to_ptr.vmem [resolvable:$true] %s1972_s6 }
 0x384   :  { %s2474_s29 = scalar_lea.vmem %s1973_s6, 3328  ;;  %s2478_s30 = scalar_lea.vmem %s1973_s6, 4096 }
 0x385   :  { %p2475_p6 = scmp.ne.s32.totalorder %s1973_s6, %s2474_s29  ;;  %p2479_p7 = scmp.lt.s32.totalorder %s1973_s6, %s1973_s6 }
 0x386   :  { %p2480_p8 = scmp.lt.s32.totalorder %s2478_s30, %s2474_s29 }
 0x388   :  { %p2481_p9 = por %p2480_p8, %p2479_p7 }
 0x38a   :  { %p2482_p10 = pnand %p2481_p9, %p2475_p6 }
 0x38c   :  { %2485 = shalt.err (!%p2482_p10)
}
 0x38d   :  { %1978 = dma.vmem_to_hbm [thread:$0]  %s1973_s6, 3328, %s3079_s7, [#allocation4], %s2503_s27, %s2503_s27, %s2504_s28  }
 0x38e   :  { %2500 = dma.done.wait [#allocation4], 4096  }
 0x38f   :  { %2501 = vsyncadd [#allocation4], 4294963200 }
 0x390   :  { %1982 = vsyncpa [#allocation3], 1 }
 0x391   :  { %1983 = vsyncpa [#allocation6], 1 }
 0x392   :  { %1984 = vsyncpa [#allocation9], 1 }
 0x393   :  { %1985 = vsyncpa [#allocation4], 1 }

</bundles_post_ra>
